<compile_context>
chip_gen: v7x
topology: tpu7x:2x2x1
jax: 0.10.0
libtpu: 0.0.40
codegen_flags: <defaults>
</compile_context>

<pallas_src>
import functools

import jax
import jax.numpy as jnp
import numpy as np
from jax import lax
from jax.experimental import pallas as pl
from jax.experimental.pallas import tpu as pltpu


def lstm_kernel(x_ref, h0_ref, c0_ref, wih_ref, whh_ref, b_ref,
                out_ref, hN_ref, cN_ref, h_sc, c_sc):
    """One (batch_block, time_chunk) grid step of a single-layer LSTM.

    x_ref:   (BB, T, D)   batch-first input chunk
    h0_ref:  (BB, H)      initial hidden state (used at the first time chunk)
    c0_ref:  (BB, H)      initial cell state
    wih_ref: (D, 4H)      input->gates weights (pre-transposed, order i,f,g,o)
    whh_ref: (H, 4H)      hidden->gates weights (pre-transposed)
    b_ref:   (1, 4H)      combined bias (b_ih + b_hh, forget bias folded in)
    out_ref: (BB, T, H)   per-step hidden outputs for this chunk
    hN_ref:  (BB, H)      final hidden state (valid after last time chunk)
    cN_ref:  (BB, H)      final cell state
    h_sc, c_sc: (BB, H) f32 VMEM scratch carrying the recurrent state across
                time chunks (scratch persists across grid iterations).
    """
    t_blk = pl.program_id(1)

    @pl.when(t_blk == 0)
    def _init():
        h_sc[...] = h0_ref[...].astype(jnp.float32)
        c_sc[...] = c0_ref[...].astype(jnp.float32)

    bb, T, D = x_ref.shape
    H = h_sc.shape[-1]

    mm_dtype = wih_ref.dtype          # f32 by default; bf16 if caller casts weights
    wih = wih_ref[...]
    whh = whh_ref[...]
    bias = b_ref[...].astype(jnp.float32)

    # ---- Hoisted input projection: one matmul for the whole time chunk. ----
    # (BB*T, D) @ (D, 4H): many rows per MXU pass instead of T tiny matmuls.
    # The flat reshape is layout-preserving when T is a multiple of the f32
    # sublane tile (8) or BB == 1; otherwise fall back to per-step projection.
    flat_ok = (T % 8 == 0) or (bb == 1)
    if flat_ok:
        x_flat = x_ref[...].reshape(bb * T, D).astype(mm_dtype)
        gx = jnp.dot(x_flat, wih, preferred_element_type=jnp.float32) + bias
        gx = gx.reshape(bb, T, 4 * H)
    else:
        gx = None

    # ---- Recurrence: statically unrolled (T is a small compile-time const). --
    h = h_sc[...]
    c = c_sc[...]
    for t in range(T):
        if gx is not None:
            g_x = gx[:, t, :]
        else:
            g_x = jnp.dot(x_ref[:, t, :].astype(mm_dtype), wih,
                          preferred_element_type=jnp.float32) + bias
        gates = g_x + jnp.dot(h.astype(mm_dtype), whh,
                              preferred_element_type=jnp.float32)
        # One EUP pass over the full 4H-wide vector instead of 3 per-gate passes.
        sig = jax.nn.sigmoid(gates)
        i_g = sig[:, 0 * H:1 * H]
        f_g = sig[:, 1 * H:2 * H]
        o_g = sig[:, 3 * H:4 * H]
        g_g = jnp.tanh(gates[:, 2 * H:3 * H])
        c = f_g * c + i_g * g_g
        h = o_g * jnp.tanh(c)
        out_ref[:, t, :] = h.astype(out_ref.dtype)

    # Carry state to the next time chunk; latest values land in hN/cN (their
    # output block is resident across the time axis, written back at the end).
    h_sc[...] = h
    c_sc[...] = c
    hN_ref[...] = h.astype(hN_ref.dtype)
    cN_ref[...] = c.astype(cN_ref.dtype)


def _pick_time_chunk(S, max_chunk=32):
    """Time-chunk length: divides S, multiple of 8 when possible (tiling)."""
    if S <= max_chunk:
        return S
    for T in range(max_chunk, 7, -1):
        if S % T == 0 and T % 8 == 0:
            return T
    return S  # fall back: whole sequence resident in one chunk


def _pick_batch_block(B):
    """Batch block: divisor of B, multiple of 8 (TC-shardable) or full batch."""
    if B % 8 == 0:
        return 8
    return B


def pallas_lstm_forward(input_tensor, memories, params, matmul_dtype=None):
    """Mirrors LSTM.forward: (input (B,S,D), memories (1,B,2H)) ->
       (lstm_out (B,S,H), output_mem (1,B,2H))."""
    w_ih, w_hh, b_ih, b_hh = params   # torch shapes: (4H,D), (4H,H), (4H,), (4H,)
    B, S, D = input_tensor.shape
    H = w_hh.shape[1]

    h0 = memories[0, :, :H]
    c0 = memories[0, :, H:]

    # Pre-transpose weights and combine biases (host-side glue).
    wih_t = jnp.transpose(w_ih)               # (D, 4H)
    whh_t = jnp.transpose(w_hh)               # (H, 4H)
    if matmul_dtype is not None:              # e.g. bf16 on v6e/v7x at large shapes
        wih_t = wih_t.astype(matmul_dtype)
        whh_t = whh_t.astype(matmul_dtype)
    bias = (b_ih + b_hh).reshape(1, 4 * H)    # (1, 4H)

    T = _pick_time_chunk(S)
    bb = _pick_batch_block(B)
    grid = (B // bb, S // T)

    dtype = input_tensor.dtype

    out_seq, h_n, c_n = pl.pallas_call(
        lstm_kernel,
        out_shape=(
            jax.ShapeDtypeStruct((B, S, H), dtype),
            jax.ShapeDtypeStruct((B, H), dtype),
            jax.ShapeDtypeStruct((B, H), dtype),
        ),
        grid_spec=pltpu.PrefetchScalarGridSpec(
            num_scalar_prefetch=0,
            grid=grid,
            in_specs=[
                pl.BlockSpec((bb, T, D), lambda b, t: (b, t, 0)),   # x chunk
                pl.BlockSpec((bb, H), lambda b, t: (b, 0)),         # h0
                pl.BlockSpec((bb, H), lambda b, t: (b, 0)),         # c0
                pl.BlockSpec((D, 4 * H), lambda b, t: (0, 0)),      # Wih (resident)
                pl.BlockSpec((H, 4 * H), lambda b, t: (0, 0)),      # Whh (resident)
                pl.BlockSpec((1, 4 * H), lambda b, t: (0, 0)),      # bias (resident)
            ],
            out_specs=(
                pl.BlockSpec((bb, T, H), lambda b, t: (b, t, 0)),   # lstm_out chunk
                pl.BlockSpec((bb, H), lambda b, t: (b, 0)),         # h_n
                pl.BlockSpec((bb, H), lambda b, t: (b, 0)),         # c_n
            ),
            scratch_shapes=[
                pltpu.VMEM((bb, H), jnp.float32),   # h carry across time chunks
                pltpu.VMEM((bb, H), jnp.float32),   # c carry across time chunks
            ],
        ),
        compiler_params=pltpu.CompilerParams(
            dimension_semantics=("parallel", "arbitrary")),
    )(input_tensor, h0, c0, wih_t, whh_t, bias)

    output_mem = jnp.concatenate([h_n, c_n], axis=-1)[None]   # (1, B, 2H)
    return out_seq, output_mem


def init_lstm_params(key, input_size, hidden_size, forget_bias=1.0):
    """Deterministic parameter init matching lstm_layer():
       XavierGlorotUniform per gate block of the weights, zero biases,
       forget_bias added to the forget block (idx 1) of bias_ih."""
    H = hidden_size

    def xavier_uniform(k, shape):
        fan_out, fan_in = shape          # torch 2D: dim0=fan_out, dim1=fan_in
        bound = float(np.sqrt(6.0 / (fan_in + fan_out)))
        return jax.random.uniform(k, shape, jnp.float32, -bound, bound)

    keys = jax.random.split(key, 8)
    w_ih = jnp.concatenate(
        [xavier_uniform(keys[i], (H, input_size)) for i in range(4)], axis=0)
    w_hh = jnp.concatenate(
        [xavier_uniform(keys[4 + i], (H, H)) for i in range(4)], axis=0)
    b_ih = jnp.zeros((4 * H,), jnp.float32)
    b_ih = b_ih.at[H:2 * H].add(forget_bias)   # forget gate bias offset
    b_hh = jnp.zeros((4 * H,), jnp.float32)
    return w_ih, w_hh, b_ih, b_hh


def reference_lstm_forward(input_tensor, memories, params):
    """Pure-JAX reference of torch.nn.LSTM (single layer, batch_first)."""
    w_ih, w_hh, b_ih, b_hh = params
    H = w_hh.shape[1]
    h0 = memories[0, :, :H]
    c0 = memories[0, :, H:]

    def step(carry, x_t):
        h, c = carry
        gates = x_t @ w_ih.T + b_ih + h @ w_hh.T + b_hh
        i_g = jax.nn.sigmoid(gates[:, 0 * H:1 * H])
        f_g = jax.nn.sigmoid(gates[:, 1 * H:2 * H])
        g_g = jnp.tanh(gates[:, 2 * H:3 * H])
        o_g = jax.nn.sigmoid(gates[:, 3 * H:4 * H])
        c_new = f_g * c + i_g * g_g
        h_new = o_g * jnp.tanh(c_new)
        return (h_new, c_new), h_new

    x_tm = jnp.transpose(input_tensor, (1, 0, 2))
    (h_n, c_n), outs = lax.scan(step, (h0, c0), x_tm)
    lstm_out = jnp.transpose(outs, (1, 0, 2))
    output_mem = jnp.concatenate([h_n, c_n], axis=-1)[None]
    return lstm_out, output_mem


if __name__ == "__main__":
    batch = 2
    seq = 8
    input_size = 16
    memory_size = 64               # -> hidden_size = 32
    hidden_size = memory_size // 2

    root = jax.random.PRNGKey(0)
    k_params, k_x, k_mem = jax.random.split(root, 3)

    params = init_lstm_params(k_params, input_size, hidden_size, forget_bias=1.0)
    x = jax.random.normal(k_x, (batch, seq, input_size), jnp.float32)
    memories = jax.random.normal(k_mem, (1, batch, memory_size), jnp.float32)

    fwd = jax.jit(functools.partial(pallas_lstm_forward, params=params))
    lstm_out, output_mem = fwd(x, memories)
    jax.block_until_ready((lstm_out, output_mem))

    # Correctness check vs pure-JAX reference of the PyTorch module.
    ref_out, ref_mem = reference_lstm_forward(x, memories, params)
    np.testing.assert_allclose(np.asarray(lstm_out), np.asarray(ref_out),
                               rtol=1e-4, atol=1e-5)
    np.testing.assert_allclose(np.asarray(output_mem), np.asarray(ref_mem),
                               rtol=1e-4, atol=1e-5)

    assert lstm_out.shape == (batch, seq, hidden_size)
    assert output_mem.shape == (1, batch, memory_size)
    print("KERNEL_OK")
</pallas_src>

<mosaic_0001>
module attributes {stable_mosaic.version = 11 : i64} {
  func.func @lstm_kernel(%arg0: i32, %arg1: i32, %arg2: memref<2x8x16xf32, #tpu.memory_space<vmem>>, %arg3: memref<2x32xf32, #tpu.memory_space<vmem>>, %arg4: memref<2x32xf32, #tpu.memory_space<vmem>>, %arg5: memref<16x128xf32, #tpu.memory_space<vmem>>, %arg6: memref<32x128xf32, #tpu.memory_space<vmem>>, %arg7: memref<1x128xf32, #tpu.memory_space<vmem>>, %arg8: memref<2x8x32xf32, #tpu.memory_space<vmem>>, %arg9: memref<2x32xf32, #tpu.memory_space<vmem>>, %arg10: memref<2x32xf32, #tpu.memory_space<vmem>>, %arg11: memref<2x32xf32, #tpu.memory_space<vmem>>, %arg12: memref<2x32xf32, #tpu.memory_space<vmem>>) attributes {dimension_semantics = [#tpu.dimension_semantics<parallel>, #tpu.dimension_semantics<arbitrary>], iteration_bounds = array<i64: 1, 1>, scalar_prefetch = 0 : i64, scratch_operands = 2 : i64, tpu.core_type = #tpu.core_type<tc>, window_params = [{transform_indices = @transform_0, window_bounds = array<i64: 2, 8, 16>}, {transform_indices = @transform_1, window_bounds = array<i64: 2, 32>}, {transform_indices = @transform_2, window_bounds = array<i64: 2, 32>}, {pipeline_mode = #tpu.pipeline_mode<synchronous>, transform_indices = @transform_3, window_bounds = array<i64: 16, 128>}, {pipeline_mode = #tpu.pipeline_mode<synchronous>, transform_indices = @transform_4, window_bounds = array<i64: 32, 128>}, {pipeline_mode = #tpu.pipeline_mode<synchronous>, transform_indices = @transform_5, window_bounds = array<i64: 1, 128>}, {transform_indices = @transform_6, window_bounds = array<i64: 2, 8, 32>}, {transform_indices = @transform_7, window_bounds = array<i64: 2, 32>}, {transform_indices = @transform_8, window_bounds = array<i64: 2, 32>}]} {
    %c0_i32 = arith.constant 0 : i32
    %0 = arith.cmpi eq, %arg1, %c0_i32 : i32
    %1 = arith.extui %0 : i1 to i32
    %c0_i32_0 = arith.constant 0 : i32
    %2 = arith.cmpi ne, %1, %c0_i32_0 : i32
    scf.if %2 {
      %c0_54 = arith.constant 0 : index
      %c0_55 = arith.constant 0 : index
      %194 = vector.load %arg3[%c0_54, %c0_55] : memref<2x32xf32, #tpu.memory_space<vmem>>, vector<2x32xf32>
      %c0_56 = arith.constant 0 : index
      %c0_57 = arith.constant 0 : index
      %195 = vector.load %arg11[%c0_56, %c0_57] : memref<2x32xf32, #tpu.memory_space<vmem>>, vector<2x32xf32>
      tpu.vector_store %arg11[%c0_56, %c0_57], %194 {strides = array<i32>} : memref<2x32xf32, #tpu.memory_space<vmem>>, vector<2x32xf32>,
      %c0_58 = arith.constant 0 : index
      %c0_59 = arith.constant 0 : index
      %196 = vector.load %arg4[%c0_58, %c0_59] : memref<2x32xf32, #tpu.memory_space<vmem>>, vector<2x32xf32>
      %c0_60 = arith.constant 0 : index
      %c0_61 = arith.constant 0 : index
      %197 = vector.load %arg12[%c0_60, %c0_61] : memref<2x32xf32, #tpu.memory_space<vmem>>, vector<2x32xf32>
      tpu.vector_store %arg12[%c0_60, %c0_61], %196 {strides = array<i32>} : memref<2x32xf32, #tpu.memory_space<vmem>>, vector<2x32xf32>,
    } else {
    }
    %c0 = arith.constant 0 : index
    %c0_1 = arith.constant 0 : index
    %3 = vector.load %arg5[%c0, %c0_1] : memref<16x128xf32, #tpu.memory_space<vmem>>, vector<16x128xf32>
    %c0_2 = arith.constant 0 : index
    %c0_3 = arith.constant 0 : index
    %4 = vector.load %arg6[%c0_2, %c0_3] : memref<32x128xf32, #tpu.memory_space<vmem>>, vector<32x128xf32>
    %c0_4 = arith.constant 0 : index
    %c0_5 = arith.constant 0 : index
    %5 = vector.load %arg7[%c0_4, %c0_5] : memref<1x128xf32, #tpu.memory_space<vmem>>, vector<1x128xf32>
    %c0_6 = arith.constant 0 : index
    %c0_7 = arith.constant 0 : index
    %c0_8 = arith.constant 0 : index
    %6 = vector.load %arg2[%c0_6, %c0_7, %c0_8] : memref<2x8x16xf32, #tpu.memory_space<vmem>>, vector<2x8x16xf32>
    %7 = vector.shape_cast %6 : vector<2x8x16xf32> to vector<16x16xf32>
    %cst = arith.constant dense<0.000000e+00> : vector<16x128xf32>
    %8 = tpu.matmul %7, %3, %cst {dimension_numbers = #tpu.dot_dimension_numbers<[1], [0], [0], [1], [0, 0, 1, 1], [], []>} : vector<16x16xf32>, vector<16x128xf32>, vector<16x128xf32> -> vector<16x128xf32>
    %9 = vector.broadcast %5 : vector<1x128xf32> to vector<16x128xf32>
    %10 = arith.addf %8, %9 : vector<16x128xf32>
    %11 = vector.shape_cast %10 : vector<16x128xf32> to vector<2x8x128xf32>
    %c0_9 = arith.constant 0 : index
    %c0_10 = arith.constant 0 : index
    %12 = vector.load %arg11[%c0_9, %c0_10] : memref<2x32xf32, #tpu.memory_space<vmem>>, vector<2x32xf32>
    %c0_11 = arith.constant 0 : index
    %c0_12 = arith.constant 0 : index
    %13 = vector.load %arg12[%c0_11, %c0_12] : memref<2x32xf32, #tpu.memory_space<vmem>>, vector<2x32xf32>
    %14 = vector.extract_strided_slice %11 {offsets = [0, 0, 0], sizes = [2, 1, 128], strides = [1, 1, 1]} : vector<2x8x128xf32> to vector<2x1x128xf32>
    %15 = vector.shape_cast %14 : vector<2x1x128xf32> to vector<2x128xf32>
    %cst_13 = arith.constant dense<0.000000e+00> : vector<2x128xf32>
    %16 = tpu.matmul %12, %4, %cst_13 {dimension_numbers = #tpu.dot_dimension_numbers<[1], [0], [0], [1], [0, 0, 1, 1], [], []>} : vector<2x32xf32>, vector<32x128xf32>, vector<2x128xf32> -> vector<2x128xf32>
    %17 = arith.addf %15, %16 : vector<2x128xf32>
    %18 = arith.negf %17 : vector<2x128xf32>
    %19 = math.exp %18 : vector<2x128xf32>
    %cst_14 = arith.constant 1.000000e+00 : f32
    %20 = vector.broadcast %cst_14 : f32 to vector<2x128xf32>
    %21 = arith.addf %20, %19 : vector<2x128xf32>
    %22 = arith.divf %20, %21 : vector<2x128xf32>
    %23 = vector.extract_strided_slice %22 {offsets = [0, 0], sizes = [2, 32], strides = [1, 1]} : vector<2x128xf32> to vector<2x32xf32>
    %24 = vector.extract_strided_slice %22 {offsets = [0, 32], sizes = [2, 32], strides = [1, 1]} : vector<2x128xf32> to vector<2x32xf32>
    %25 = vector.extract_strided_slice %22 {offsets = [0, 96], sizes = [2, 32], strides = [1, 1]} : vector<2x128xf32> to vector<2x32xf32>
    %26 = vector.extract_strided_slice %17 {offsets = [0, 64], sizes = [2, 32], strides = [1, 1]} : vector<2x128xf32> to vector<2x32xf32>
    %27 = math.tanh %26 : vector<2x32xf32>
    %28 = arith.mulf %24, %13 : vector<2x32xf32>
    %29 = arith.mulf %23, %27 : vector<2x32xf32>
    %30 = arith.addf %28, %29 : vector<2x32xf32>
    %31 = math.tanh %30 : vector<2x32xf32>
    %32 = arith.mulf %25, %31 : vector<2x32xf32>
    %c0_15 = arith.constant 0 : index
    %c0_16 = arith.constant 0 : index
    %c0_17 = arith.constant 0 : index
    %33 = vector.load %arg8[%c0_15, %c0_16, %c0_17] : memref<2x8x32xf32, #tpu.memory_space<vmem>>, vector<2x1x32xf32>
    %34 = vector.shape_cast %33 : vector<2x1x32xf32> to vector<2x32xf32>
    %35 = vector.shape_cast %32 : vector<2x32xf32> to vector<2x1x32xf32>
    tpu.vector_store %arg8[%c0_15, %c0_16, %c0_17], %35 {strides = array<i32>} : memref<2x8x32xf32, #tpu.memory_space<vmem>>, vector<2x1x32xf32>,
    %36 = vector.extract_strided_slice %11 {offsets = [0, 1, 0], sizes = [2, 1, 128], strides = [1, 1, 1]} : vector<2x8x128xf32> to vector<2x1x128xf32>
    %37 = vector.shape_cast %36 : vector<2x1x128xf32> to vector<2x128xf32>
    %cst_18 = arith.constant dense<0.000000e+00> : vector<2x128xf32>
    %38 = tpu.matmul %32, %4, %cst_18 {dimension_numbers = #tpu.dot_dimension_numbers<[1], [0], [0], [1], [0, 0, 1, 1], [], []>} : vector<2x32xf32>, vector<32x128xf32>, vector<2x128xf32> -> vector<2x128xf32>
    %39 = arith.addf %37, %38 : vector<2x128xf32>
    %40 = arith.negf %39 : vector<2x128xf32>
    %41 = math.exp %40 : vector<2x128xf32>
    %cst_19 = arith.constant 1.000000e+00 : f32
    %42 = vector.broadcast %cst_19 : f32 to vector<2x128xf32>
    %43 = arith.addf %42, %41 : vector<2x128xf32>
    %44 = arith.divf %42, %43 : vector<2x128xf32>
    %45 = vector.extract_strided_slice %44 {offsets = [0, 0], sizes = [2, 32], strides = [1, 1]} : vector<2x128xf32> to vector<2x32xf32>
    %46 = vector.extract_strided_slice %44 {offsets = [0, 32], sizes = [2, 32], strides = [1, 1]} : vector<2x128xf32> to vector<2x32xf32>
    %47 = vector.extract_strided_slice %44 {offsets = [0, 96], sizes = [2, 32], strides = [1, 1]} : vector<2x128xf32> to vector<2x32xf32>
    %48 = vector.extract_strided_slice %39 {offsets = [0, 64], sizes = [2, 32], strides = [1, 1]} : vector<2x128xf32> to vector<2x32xf32>
    %49 = math.tanh %48 : vector<2x32xf32>
    %50 = arith.mulf %46, %30 : vector<2x32xf32>
    %51 = arith.mulf %45, %49 : vector<2x32xf32>
    %52 = arith.addf %50, %51 : vector<2x32xf32>
    %53 = math.tanh %52 : vector<2x32xf32>
    %54 = arith.mulf %47, %53 : vector<2x32xf32>
    %c0_20 = arith.constant 0 : index
    %c1 = arith.constant 1 : index
    %c0_21 = arith.constant 0 : index
    %55 = vector.load %arg8[%c0_20, %c1, %c0_21] : memref<2x8x32xf32, #tpu.memory_space<vmem>>, vector<2x1x32xf32>
    %56 = vector.shape_cast %55 : vector<2x1x32xf32> to vector<2x32xf32>
    %57 = vector.shape_cast %54 : vector<2x32xf32> to vector<2x1x32xf32>
    tpu.vector_store %arg8[%c0_20, %c1, %c0_21], %57 {strides = array<i32>} : memref<2x8x32xf32, #tpu.memory_space<vmem>>, vector<2x1x32xf32>,
    %58 = vector.extract_strided_slice %11 {offsets = [0, 2, 0], sizes = [2, 1, 128], strides = [1, 1, 1]} : vector<2x8x128xf32> to vector<2x1x128xf32>
    %59 = vector.shape_cast %58 : vector<2x1x128xf32> to vector<2x128xf32>
    %cst_22 = arith.constant dense<0.000000e+00> : vector<2x128xf32>
    %60 = tpu.matmul %54, %4, %cst_22 {dimension_numbers = #tpu.dot_dimension_numbers<[1], [0], [0], [1], [0, 0, 1, 1], [], []>} : vector<2x32xf32>, vector<32x128xf32>, vector<2x128xf32> -> vector<2x128xf32>
    %61 = arith.addf %59, %60 : vector<2x128xf32>
    %62 = arith.negf %61 : vector<2x128xf32>
    %63 = math.exp %62 : vector<2x128xf32>
    %cst_23 = arith.constant 1.000000e+00 : f32
    %64 = vector.broadcast %cst_23 : f32 to vector<2x128xf32>
    %65 = arith.addf %64, %63 : vector<2x128xf32>
    %66 = arith.divf %64, %65 : vector<2x128xf32>
    %67 = vector.extract_strided_slice %66 {offsets = [0, 0], sizes = [2, 32], strides = [1, 1]} : vector<2x128xf32> to vector<2x32xf32>
    %68 = vector.extract_strided_slice %66 {offsets = [0, 32], sizes = [2, 32], strides = [1, 1]} : vector<2x128xf32> to vector<2x32xf32>
    %69 = vector.extract_strided_slice %66 {offsets = [0, 96], sizes = [2, 32], strides = [1, 1]} : vector<2x128xf32> to vector<2x32xf32>
    %70 = vector.extract_strided_slice %61 {offsets = [0, 64], sizes = [2, 32], strides = [1, 1]} : vector<2x128xf32> to vector<2x32xf32>
    %71 = math.tanh %70 : vector<2x32xf32>
    %72 = arith.mulf %68, %52 : vector<2x32xf32>
    %73 = arith.mulf %67, %71 : vector<2x32xf32>
    %74 = arith.addf %72, %73 : vector<2x32xf32>
    %75 = math.tanh %74 : vector<2x32xf32>
    %76 = arith.mulf %69, %75 : vector<2x32xf32>
    %c0_24 = arith.constant 0 : index
    %c2 = arith.constant 2 : index
    %c0_25 = arith.constant 0 : index
    %77 = vector.load %arg8[%c0_24, %c2, %c0_25] : memref<2x8x32xf32, #tpu.memory_space<vmem>>, vector<2x1x32xf32>
    %78 = vector.shape_cast %77 : vector<2x1x32xf32> to vector<2x32xf32>
    %79 = vector.shape_cast %76 : vector<2x32xf32> to vector<2x1x32xf32>
    tpu.vector_store %arg8[%c0_24, %c2, %c0_25], %79 {strides = array<i32>} : memref<2x8x32xf32, #tpu.memory_space<vmem>>, vector<2x1x32xf32>,
    %80 = vector.extract_strided_slice %11 {offsets = [0, 3, 0], sizes = [2, 1, 128], strides = [1, 1, 1]} : vector<2x8x128xf32> to vector<2x1x128xf32>
    %81 = vector.shape_cast %80 : vector<2x1x128xf32> to vector<2x128xf32>
    %cst_26 = arith.constant dense<0.000000e+00> : vector<2x128xf32>
    %82 = tpu.matmul %76, %4, %cst_26 {dimension_numbers = #tpu.dot_dimension_numbers<[1], [0], [0], [1], [0, 0, 1, 1], [], []>} : vector<2x32xf32>, vector<32x128xf32>, vector<2x128xf32> -> vector<2x128xf32>
    %83 = arith.addf %81, %82 : vector<2x128xf32>
    %84 = arith.negf %83 : vector<2x128xf32>
    %85 = math.exp %84 : vector<2x128xf32>
    %cst_27 = arith.constant 1.000000e+00 : f32
    %86 = vector.broadcast %cst_27 : f32 to vector<2x128xf32>
    %87 = arith.addf %86, %85 : vector<2x128xf32>
    %88 = arith.divf %86, %87 : vector<2x128xf32>
    %89 = vector.extract_strided_slice %88 {offsets = [0, 0], sizes = [2, 32], strides = [1, 1]} : vector<2x128xf32> to vector<2x32xf32>
    %90 = vector.extract_strided_slice %88 {offsets = [0, 32], sizes = [2, 32], strides = [1, 1]} : vector<2x128xf32> to vector<2x32xf32>
    %91 = vector.extract_strided_slice %88 {offsets = [0, 96], sizes = [2, 32], strides = [1, 1]} : vector<2x128xf32> to vector<2x32xf32>
    %92 = vector.extract_strided_slice %83 {offsets = [0, 64], sizes = [2, 32], strides = [1, 1]} : vector<2x128xf32> to vector<2x32xf32>
    %93 = math.tanh %92 : vector<2x32xf32>
    %94 = arith.mulf %90, %74 : vector<2x32xf32>
    %95 = arith.mulf %89, %93 : vector<2x32xf32>
    %96 = arith.addf %94, %95 : vector<2x32xf32>
    %97 = math.tanh %96 : vector<2x32xf32>
    %98 = arith.mulf %91, %97 : vector<2x32xf32>
    %c0_28 = arith.constant 0 : index
    %c3 = arith.constant 3 : index
    %c0_29 = arith.constant 0 : index
    %99 = vector.load %arg8[%c0_28, %c3, %c0_29] : memref<2x8x32xf32, #tpu.memory_space<vmem>>, vector<2x1x32xf32>
    %100 = vector.shape_cast %99 : vector<2x1x32xf32> to vector<2x32xf32>
    %101 = vector.shape_cast %98 : vector<2x32xf32> to vector<2x1x32xf32>
    tpu.vector_store %arg8[%c0_28, %c3, %c0_29], %101 {strides = array<i32>} : memref<2x8x32xf32, #tpu.memory_space<vmem>>, vector<2x1x32xf32>,
    %102 = vector.extract_strided_slice %11 {offsets = [0, 4, 0], sizes = [2, 1, 128], strides = [1, 1, 1]} : vector<2x8x128xf32> to vector<2x1x128xf32>
    %103 = vector.shape_cast %102 : vector<2x1x128xf32> to vector<2x128xf32>
    %cst_30 = arith.constant dense<0.000000e+00> : vector<2x128xf32>
    %104 = tpu.matmul %98, %4, %cst_30 {dimension_numbers = #tpu.dot_dimension_numbers<[1], [0], [0], [1], [0, 0, 1, 1], [], []>} : vector<2x32xf32>, vector<32x128xf32>, vector<2x128xf32> -> vector<2x128xf32>
    %105 = arith.addf %103, %104 : vector<2x128xf32>
    %106 = arith.negf %105 : vector<2x128xf32>
    %107 = math.exp %106 : vector<2x128xf32>
    %cst_31 = arith.constant 1.000000e+00 : f32
    %108 = vector.broadcast %cst_31 : f32 to vector<2x128xf32>
    %109 = arith.addf %108, %107 : vector<2x128xf32>
    %110 = arith.divf %108, %109 : vector<2x128xf32>
    %111 = vector.extract_strided_slice %110 {offsets = [0, 0], sizes = [2, 32], strides = [1, 1]} : vector<2x128xf32> to vector<2x32xf32>
    %112 = vector.extract_strided_slice %110 {offsets = [0, 32], sizes = [2, 32], strides = [1, 1]} : vector<2x128xf32> to vector<2x32xf32>
    %113 = vector.extract_strided_slice %110 {offsets = [0, 96], sizes = [2, 32], strides = [1, 1]} : vector<2x128xf32> to vector<2x32xf32>
    %114 = vector.extract_strided_slice %105 {offsets = [0, 64], sizes = [2, 32], strides = [1, 1]} : vector<2x128xf32> to vector<2x32xf32>
    %115 = math.tanh %114 : vector<2x32xf32>
    %116 = arith.mulf %112, %96 : vector<2x32xf32>
    %117 = arith.mulf %111, %115 : vector<2x32xf32>
    %118 = arith.addf %116, %117 : vector<2x32xf32>
    %119 = math.tanh %118 : vector<2x32xf32>
    %120 = arith.mulf %113, %119 : vector<2x32xf32>
    %c0_32 = arith.constant 0 : index
    %c4 = arith.constant 4 : index
    %c0_33 = arith.constant 0 : index
    %121 = vector.load %arg8[%c0_32, %c4, %c0_33] : memref<2x8x32xf32, #tpu.memory_space<vmem>>, vector<2x1x32xf32>
    %122 = vector.shape_cast %121 : vector<2x1x32xf32> to vector<2x32xf32>
    %123 = vector.shape_cast %120 : vector<2x32xf32> to vector<2x1x32xf32>
    tpu.vector_store %arg8[%c0_32, %c4, %c0_33], %123 {strides = array<i32>} : memref<2x8x32xf32, #tpu.memory_space<vmem>>, vector<2x1x32xf32>,
    %124 = vector.extract_strided_slice %11 {offsets = [0, 5, 0], sizes = [2, 1, 128], strides = [1, 1, 1]} : vector<2x8x128xf32> to vector<2x1x128xf32>
    %125 = vector.shape_cast %124 : vector<2x1x128xf32> to vector<2x128xf32>
    %cst_34 = arith.constant dense<0.000000e+00> : vector<2x128xf32>
    %126 = tpu.matmul %120, %4, %cst_34 {dimension_numbers = #tpu.dot_dimension_numbers<[1], [0], [0], [1], [0, 0, 1, 1], [], []>} : vector<2x32xf32>, vector<32x128xf32>, vector<2x128xf32> -> vector<2x128xf32>
    %127 = arith.addf %125, %126 : vector<2x128xf32>
    %128 = arith.negf %127 : vector<2x128xf32>
    %129 = math.exp %128 : vector<2x128xf32>
    %cst_35 = arith.constant 1.000000e+00 : f32
    %130 = vector.broadcast %cst_35 : f32 to vector<2x128xf32>
    %131 = arith.addf %130, %129 : vector<2x128xf32>
    %132 = arith.divf %130, %131 : vector<2x128xf32>
    %133 = vector.extract_strided_slice %132 {offsets = [0, 0], sizes = [2, 32], strides = [1, 1]} : vector<2x128xf32> to vector<2x32xf32>
    %134 = vector.extract_strided_slice %132 {offsets = [0, 32], sizes = [2, 32], strides = [1, 1]} : vector<2x128xf32> to vector<2x32xf32>
    %135 = vector.extract_strided_slice %132 {offsets = [0, 96], sizes = [2, 32], strides = [1, 1]} : vector<2x128xf32> to vector<2x32xf32>
    %136 = vector.extract_strided_slice %127 {offsets = [0, 64], sizes = [2, 32], strides = [1, 1]} : vector<2x128xf32> to vector<2x32xf32>
    %137 = math.tanh %136 : vector<2x32xf32>
    %138 = arith.mulf %134, %118 : vector<2x32xf32>
    %139 = arith.mulf %133, %137 : vector<2x32xf32>
    %140 = arith.addf %138, %139 : vector<2x32xf32>
    %141 = math.tanh %140 : vector<2x32xf32>
    %142 = arith.mulf %135, %141 : vector<2x32xf32>
    %c0_36 = arith.constant 0 : index
    %c5 = arith.constant 5 : index
    %c0_37 = arith.constant 0 : index
    %143 = vector.load %arg8[%c0_36, %c5, %c0_37] : memref<2x8x32xf32, #tpu.memory_space<vmem>>, vector<2x1x32xf32>
    %144 = vector.shape_cast %143 : vector<2x1x32xf32> to vector<2x32xf32>
    %145 = vector.shape_cast %142 : vector<2x32xf32> to vector<2x1x32xf32>
    tpu.vector_store %arg8[%c0_36, %c5, %c0_37], %145 {strides = array<i32>} : memref<2x8x32xf32, #tpu.memory_space<vmem>>, vector<2x1x32xf32>,
    %146 = vector.extract_strided_slice %11 {offsets = [0, 6, 0], sizes = [2, 1, 128], strides = [1, 1, 1]} : vector<2x8x128xf32> to vector<2x1x128xf32>
    %147 = vector.shape_cast %146 : vector<2x1x128xf32> to vector<2x128xf32>
    %cst_38 = arith.constant dense<0.000000e+00> : vector<2x128xf32>
    %148 = tpu.matmul %142, %4, %cst_38 {dimension_numbers = #tpu.dot_dimension_numbers<[1], [0], [0], [1], [0, 0, 1, 1], [], []>} : vector<2x32xf32>, vector<32x128xf32>, vector<2x128xf32> -> vector<2x128xf32>
    %149 = arith.addf %147, %148 : vector<2x128xf32>
    %150 = arith.negf %149 : vector<2x128xf32>
    %151 = math.exp %150 : vector<2x128xf32>
    %cst_39 = arith.constant 1.000000e+00 : f32
    %152 = vector.broadcast %cst_39 : f32 to vector<2x128xf32>
    %153 = arith.addf %152, %151 : vector<2x128xf32>
    %154 = arith.divf %152, %153 : vector<2x128xf32>
    %155 = vector.extract_strided_slice %154 {offsets = [0, 0], sizes = [2, 32], strides = [1, 1]} : vector<2x128xf32> to vector<2x32xf32>
    %156 = vector.extract_strided_slice %154 {offsets = [0, 32], sizes = [2, 32], strides = [1, 1]} : vector<2x128xf32> to vector<2x32xf32>
    %157 = vector.extract_strided_slice %154 {offsets = [0, 96], sizes = [2, 32], strides = [1, 1]} : vector<2x128xf32> to vector<2x32xf32>
    %158 = vector.extract_strided_slice %149 {offsets = [0, 64], sizes = [2, 32], strides = [1, 1]} : vector<2x128xf32> to vector<2x32xf32>
    %159 = math.tanh %158 : vector<2x32xf32>
    %160 = arith.mulf %156, %140 : vector<2x32xf32>
    %161 = arith.mulf %155, %159 : vector<2x32xf32>
    %162 = arith.addf %160, %161 : vector<2x32xf32>
    %163 = math.tanh %162 : vector<2x32xf32>
    %164 = arith.mulf %157, %163 : vector<2x32xf32>
    %c0_40 = arith.constant 0 : index
    %c6 = arith.constant 6 : index
    %c0_41 = arith.constant 0 : index
    %165 = vector.load %arg8[%c0_40, %c6, %c0_41] : memref<2x8x32xf32, #tpu.memory_space<vmem>>, vector<2x1x32xf32>
    %166 = vector.shape_cast %165 : vector<2x1x32xf32> to vector<2x32xf32>
    %167 = vector.shape_cast %164 : vector<2x32xf32> to vector<2x1x32xf32>
    tpu.vector_store %arg8[%c0_40, %c6, %c0_41], %167 {strides = array<i32>} : memref<2x8x32xf32, #tpu.memory_space<vmem>>, vector<2x1x32xf32>,
    %168 = vector.extract_strided_slice %11 {offsets = [0, 7, 0], sizes = [2, 1, 128], strides = [1, 1, 1]} : vector<2x8x128xf32> to vector<2x1x128xf32>
    %169 = vector.shape_cast %168 : vector<2x1x128xf32> to vector<2x128xf32>
    %cst_42 = arith.constant dense<0.000000e+00> : vector<2x128xf32>
    %170 = tpu.matmul %164, %4, %cst_42 {dimension_numbers = #tpu.dot_dimension_numbers<[1], [0], [0], [1], [0, 0, 1, 1], [], []>} : vector<2x32xf32>, vector<32x128xf32>, vector<2x128xf32> -> vector<2x128xf32>
    %171 = arith.addf %169, %170 : vector<2x128xf32>
    %172 = arith.negf %171 : vector<2x128xf32>
    %173 = math.exp %172 : vector<2x128xf32>
    %cst_43 = arith.constant 1.000000e+00 : f32
    %174 = vector.broadcast %cst_43 : f32 to vector<2x128xf32>
    %175 = arith.addf %174, %173 : vector<2x128xf32>
    %176 = arith.divf %174, %175 : vector<2x128xf32>
    %177 = vector.extract_strided_slice %176 {offsets = [0, 0], sizes = [2, 32], strides = [1, 1]} : vector<2x128xf32> to vector<2x32xf32>
    %178 = vector.extract_strided_slice %176 {offsets = [0, 32], sizes = [2, 32], strides = [1, 1]} : vector<2x128xf32> to vector<2x32xf32>
    %179 = vector.extract_strided_slice %176 {offsets = [0, 96], sizes = [2, 32], strides = [1, 1]} : vector<2x128xf32> to vector<2x32xf32>
    %180 = vector.extract_strided_slice %171 {offsets = [0, 64], sizes = [2, 32], strides = [1, 1]} : vector<2x128xf32> to vector<2x32xf32>
    %181 = math.tanh %180 : vector<2x32xf32>
    %182 = arith.mulf %178, %162 : vector<2x32xf32>
    %183 = arith.mulf %177, %181 : vector<2x32xf32>
    %184 = arith.addf %182, %183 : vector<2x32xf32>
    %185 = math.tanh %184 : vector<2x32xf32>
    %186 = arith.mulf %179, %185 : vector<2x32xf32>
    %c0_44 = arith.constant 0 : index
    %c7 = arith.constant 7 : index
    %c0_45 = arith.constant 0 : index
    %187 = vector.load %arg8[%c0_44, %c7, %c0_45] : memref<2x8x32xf32, #tpu.memory_space<vmem>>, vector<2x1x32xf32>
    %188 = vector.shape_cast %187 : vector<2x1x32xf32> to vector<2x32xf32>
    %189 = vector.shape_cast %186 : vector<2x32xf32> to vector<2x1x32xf32>
    tpu.vector_store %arg8[%c0_44, %c7, %c0_45], %189 {strides = array<i32>} : memref<2x8x32xf32, #tpu.memory_space<vmem>>, vector<2x1x32xf32>,
    %c0_46 = arith.constant 0 : index
    %c0_47 = arith.constant 0 : index
    %190 = vector.load %arg11[%c0_46, %c0_47] : memref<2x32xf32, #tpu.memory_space<vmem>>, vector<2x32xf32>
    tpu.vector_store %arg11[%c0_46, %c0_47], %186 {strides = array<i32>} : memref<2x32xf32, #tpu.memory_space<vmem>>, vector<2x32xf32>,
    %c0_48 = arith.constant 0 : index
    %c0_49 = arith.constant 0 : index
    %191 = vector.load %arg12[%c0_48, %c0_49] : memref<2x32xf32, #tpu.memory_space<vmem>>, vector<2x32xf32>
    tpu.vector_store %arg12[%c0_48, %c0_49], %184 {strides = array<i32>} : memref<2x32xf32, #tpu.memory_space<vmem>>, vector<2x32xf32>,
    %c0_50 = arith.constant 0 : index
    %c0_51 = arith.constant 0 : index
    %192 = vector.load %arg9[%c0_50, %c0_51] : memref<2x32xf32, #tpu.memory_space<vmem>>, vector<2x32xf32>
    tpu.vector_store %arg9[%c0_50, %c0_51], %186 {strides = array<i32>} : memref<2x32xf32, #tpu.memory_space<vmem>>, vector<2x32xf32>,
    %c0_52 = arith.constant 0 : index
    %c0_53 = arith.constant 0 : index
    %193 = vector.load %arg10[%c0_52, %c0_53] : memref<2x32xf32, #tpu.memory_space<vmem>>, vector<2x32xf32>
    tpu.vector_store %arg10[%c0_52, %c0_53], %184 {strides = array<i32>} : memref<2x32xf32, #tpu.memory_space<vmem>>, vector<2x32xf32>,
    return
  }
  func.func @transform_0(%arg0: i32, %arg1: i32) -> (i32, i32, i32) {
    %c0_i32 = arith.constant 0 : i32
    %c0_i32_0 = arith.constant 0 : i32
    return %arg0, %arg1, %c0_i32 : i32, i32, i32
  }
  func.func @transform_1(%arg0: i32, %arg1: i32) -> (i32, i32) {
    %c0_i32 = arith.constant 0 : i32
    %c0_i32_0 = arith.constant 0 : i32
    return %arg0, %c0_i32 : i32, i32
  }
  func.func @transform_2(%arg0: i32, %arg1: i32) -> (i32, i32) {
    %c0_i32 = arith.constant 0 : i32
    %c0_i32_0 = arith.constant 0 : i32
    return %arg0, %c0_i32 : i32, i32
  }
  func.func @transform_3(%arg0: i32, %arg1: i32) -> (i32, i32) {
    %c0_i32 = arith.constant 0 : i32
    %c0_i32_0 = arith.constant 0 : i32
    %c0_i32_1 = arith.constant 0 : i32
    return %c0_i32, %c0_i32_0 : i32, i32
  }
  func.func @transform_4(%arg0: i32, %arg1: i32) -> (i32, i32) {
    %c0_i32 = arith.constant 0 : i32
    %c0_i32_0 = arith.constant 0 : i32
    %c0_i32_1 = arith.constant 0 : i32
    return %c0_i32, %c0_i32_0 : i32, i32
  }
  func.func @transform_5(%arg0: i32, %arg1: i32) -> (i32, i32) {
    %c0_i32 = arith.constant 0 : i32
    %c0_i32_0 = arith.constant 0 : i32
    %c0_i32_1 = arith.constant 0 : i32
    return %c0_i32, %c0_i32_0 : i32, i32
  }
  func.func @transform_6(%arg0: i32, %arg1: i32) -> (i32, i32, i32) {
    %c0_i32 = arith.constant 0 : i32
    %c0_i32_0 = arith.constant 0 : i32
    return %arg0, %arg1, %c0_i32 : i32, i32, i32
  }
  func.func @transform_7(%arg0: i32, %arg1: i32) -> (i32, i32) {
    %c0_i32 = arith.constant 0 : i32
    %c0_i32_0 = arith.constant 0 : i32
    return %arg0, %c0_i32 : i32, i32
  }
  func.func @transform_8(%arg0: i32, %arg1: i32) -> (i32, i32) {
    %c0_i32 = arith.constant 0 : i32
    %c0_i32_0 = arith.constant 0 : i32
    return %arg0, %c0_i32 : i32, i32
  }
}

</mosaic_0001>

<bundles_post_ra>
// kernel: pallas_lstm_forward.1
= control target key start
LH: loop header
LB: loop body
LE: loop exit
PB: predicated region body
PF: predicated region fallthrough
CT: control target
= control target key end

     0   :  { %14 = vsyncpa [#allocation5], 0  ;;  %s2184_s0 = inlined_call_operand.hbm [shape: f32[2,8,16], index: 0, kind: input, shape index: {}]   ;;  %s2185_s1 = inlined_call_operand.vmem [shape: f32[2,32], index: 1, kind: input, shape index: {}]   ;;  %s2186_s2 = inlined_call_operand.vmem [shape: f32[2,32], index: 2, kind: input, shape index: {}]   ;;  %s2187_s3 = inlined_call_operand.vmem [shape: f32[16,128], index: 3, kind: input, shape index: {}]   ;;  %s2188_s4 = inlined_call_operand.hbm [shape: f32[32,128], index: 4, kind: input, shape index: {}]   ;;  %s2189_s5 = inlined_call_operand.vmem [shape: f32[1,128], index: 5, kind: input, shape index: {}]   ;;  %s2190_s6 = inlined_call_operand.hbm [shape: f32[2,8,32], index: 6, kind: output, shape index: {0}]   ;;  %s2191_s7 = inlined_call_operand.vmem [shape: f32[2,32], index: 7, kind: output, shape index: {1}]   ;;  %s2192_s8 = inlined_call_operand.vmem [shape: f32[2,32], index: 8, kind: output, shape index: {2}]  }
   0x1   :  { %15 = vsyncpa [#allocation8], 0 }
   0x2   :  { %16 = vsyncpa [#allocation6], 0  ;;  %s1827_s27 = smov [#allocation4]   ;;  %s1755_s9 = scalar_lea.hbm %s2184_s0, 256 }
   0x3   :  { %s22_s28 = sshll.u32 %s1827_s27, 4  ;;  %p1756_p0 = scmp.ne.s32.totalorder %s2184_s0, %s1755_s9  ;;  %s23_s28 = int_to_ptr.vmem [resolvable:$true] %s22_s28 }
   0x4   :  { %p1759_p1 = scmp.lt.u32.totalorder %s1755_s9, %s2184_s0 }
   0x6   :  { %p1761_p2 = pnand %p1759_p1, %p1756_p0 }
   0x8   :  { %1764 = shalt.err (!%p1761_p2)
}
   0x9   :  { %s1765_s14 = scalar_lea.vmem %s23_s28, 256  ;;  %p1770_p4 = scmp.lt.s32.totalorder %s23_s28, %s23_s28 }
   0xa   :  { %p1766_p3 = scmp.ne.s32.totalorder %s23_s28, %s1765_s14  ;;  %p1771_p5 = scmp.lt.s32.totalorder %s1765_s14, %s1765_s14 }
   0xc   :  { %p1772_p6 = por %p1771_p5, %p1770_p4 }
   0xe   :  { %p1773_p7 = pnand %p1772_p6, %p1766_p3 }
  0x10   :  { %1776 = shalt.err (!%p1773_p7)
}
  0x11   :  { %s1828_s15 = smov 128   ;;  %s1829_s16 = smov 8  }
  0x12   :  { %28 = dma.hbm_to_vmem [thread:$0]  %s2184_s0, 256, %s23_s28, [#allocation5], %s1828_s15, %s1828_s15, %s1829_s16  }
  0x13   :  { %s1830_s19 = smov [#allocation7]   ;;  %s1777_s23 = scalar_lea.hbm %s2188_s4, 512 }
  0x14   :  { %s40_s20 = sshll.u32 %s1830_s19, 4  ;;  %p1778_p8 = scmp.ne.s32.totalorder %s2188_s4, %s1777_s23  ;;  %s41_s20 = int_to_ptr.vmem [resolvable:$true] %s40_s20 }
  0x15   :  { %p1781_p9 = scmp.lt.u32.totalorder %s1777_s23, %s2188_s4 }
  0x17   :  { %p1783_p10 = pnand %p1781_p9, %p1778_p8 }
  0x19   :  { %1786 = shalt.err (!%p1783_p10)
}
  0x1a   :  { %s1787_s29 = scalar_lea.vmem %s41_s20, 512  ;;  %p1792_p12 = scmp.lt.s32.totalorder %s41_s20, %s41_s20 }
  0x1b   :  { %p1788_p11 = scmp.ne.s32.totalorder %s41_s20, %s1787_s29  ;;  %p1793_p13 = scmp.lt.s32.totalorder %s1787_s29, %s1787_s29 }
  0x1d   :  { %p1794_p0 = por %p1793_p13, %p1792_p12 }
  0x1f   :  { %p1795_p1 = pnand %p1794_p0, %p1788_p11 }
  0x21   :  { %1798 = shalt.err (!%p1795_p1)
}
  0x22   :  { %46 = dma.hbm_to_vmem [thread:$0]  %s2188_s4, 512, %s41_s20, [#allocation8], %s1828_s15, %s1828_s15, %s1829_s16  }
  0x23   :  { %1821 = dma.done.wait [#allocation5], 256  }
  0x24   :  { %1822 = vsyncadd [#allocation5], 4294967040 }
  0x25   :  { %1823 = dma.done.wait [#allocation8], 512  }
  0x26   :  { %1824 = vsyncadd [#allocation8], 4294966784  ;;  %v1831_v0 = vmov 0.0|0.0   ;;  %vm1832_vm0 = vmmov 0   ;;  %v1833_v1 = vmov 0.0   ;;  %vm79_vm1 = vcmask 130048  }
  0x27   :  { %1568 = vmatprep.subr.bf16.mxu1 %v1831_v0  ;;  %1484 = vmatprep.mubr.msk.f32.mxu1 %vm1832_vm0, %v1833_v1  ;;  %v64_v2 = vld [vmem:[%s2187_s3] sm:$0xff]  ;;  %v65_v3 = vld [vmem:[%s2187_s3 + $0x8] sm:$0xff]  ;;  %v66_v4 = vld [vmem:[#allocation7] sm:$0xff]  ;;  %vm60_vm2 = vcmask 254976   ;;  %vm163_vm3 = vcmask 261120   ;;  %s1835_s17 = smov 64  }
  0x28   :  { %v1564_v5 = vpack.c.bf16 %v65_v3, %v64_v2  ;;  %v67_v6 = vld [vmem:[#allocation7 + $0x8] sm:$0xff]  ;;  %v71_v7 = vld [vmem:[#allocation4] sm:$0xff]  ;;  %v69_v10 = vld [vmem:[#allocation7 + $0x18] sm:$0xff]  ;;  %vm311_vm4 = vcmask 1041409   ;;  %vm307_vm5 = vcmask 253952   ;;  %vm455_vm6 = vcmask 254977  }
  0x29   :  { %v1922_v8 = vpack.c.bf16 %v67_v6, %v66_v4  ;;  %1473 = vmatprep.mubr.msk.f32.mxu0 %vm79_vm1, %v71_v7  ;;  %v68_v9 = vld [vmem:[#allocation7 + $0x10] sm:$0xff]  ;;  %v59_v11 = vld [vmem:[%s2185_s1] sm:$0x3]  ;;  %v72_v13 = vld [vmem:[#allocation4 + $0x8] sm:$0xff]  ;;  %s1834_s1 = smov 32   ;;  %vm603_vm7 = vcmask 256002  }
  0x2a   :  { %1565 = vmatprep.subr.bf16.mxu0 %v1564_v5  ;;  %61 = vst.msk [vmem:[#allocation2] sm:$0x3] %vm60_vm2, %v59_v11  ;;  %v62_v12 = vld [vmem:[%s2186_s2] sm:$0x3]  ;;  %v1933_v14 = vpack.c.bf16 %v69_v10, %v68_v9  ;;  %vm752_vm8 = vcmask 257027   ;;  %vm901_vm9 = vcmask 258052  }
  0x2b   :  { %1570 = vmatpush3.bf16.msra.mxu1 %v1922_v8  ;;  %1567 = vmatpush3.bf16.msra.mxu0 %v1564_v5  ;;  %63 = vst.msk [vmem:[#allocation3] sm:$0x3] %vm60_vm2, %v62_v12  ;;  %v1398_v20 = vld [vmem:[%s2189_s5] ss:$0 sm:$0xff]  ;;  %s1836_s5 = smov 96   ;;  %vm1050_vm10 = vcmask 259077  }
  0x2c   :  { %1571 = vmatprep.subr.bf16.mxu1 %v1831_v0  ;;  %1574 = vmatprep.subr.bf16.mxu0 %v1831_v0  ;;  %vm1199_vm11 = vcmask 260102   ;;  %s1837_s18 = smov [#allocation9]   ;;  %vm1348_vm12 = vcmask 261127  }
  0x2d   :  { %s1377_s19 = sshll.u32 %s1837_s18, 4  ;;  %s1378_s19 = int_to_ptr.vmem [resolvable:$true] %s1377_s19 }
  0x2e   :  { %1474 = vmatmul.mubr.msk.f32.vlgmr.msra.gmra.mrb[0].mxu0 %vm79_vm1, %v72_v13  ;;  %s1799_s22 = scalar_lea.vmem %s1378_s19, 256  ;;  %p1804_p3 = scmp.lt.s32.totalorder %s1378_s19, %s1378_s19 }
  0x2f   :  { %1573 = vmatpush3.bf16.msra.mxu1 %v1933_v14  ;;  %1576 = vmatpush3.bf16.msra.mxu0 %v1922_v8  ;;  %p1800_p2 = scmp.ne.s32.totalorder %s1378_s19, %s1799_s22  ;;  %p1805_p4 = scmp.lt.s32.totalorder %s1799_s22, %s1799_s22 }
  0x30   :  { %1577 = vmatprep.subr.bf16.mxu0 %v1831_v0  ;;  %1495 = vmatprep.mubr.msk.f32.mxu0 %vm1832_vm0, %v1833_v1 }
  0x31   :  { %v161_v15 = vld [vmem:[#allocation2] sm:$0x3]  ;;  %1580 = vmatprep.subr.bf16.mxu1 %v1831_v0  ;;  %p1806_p5 = por %p1805_p4, %p1804_p3 }
  0x32   :  { %1485 = vmatmul.mubr.msk.f32.vlgmr.msra.gmra.mrb[0].mxu1 %vm163_vm3, %v161_v15  ;;  %v162_v16 = vld [vmem:[#allocation3] sm:$0x3] }
  0x33   :  { %v258_v17 = vrot.slane %v162_v16, 1  ;;  %1579 = vmatpush3.bf16.msra.mxu0 %v1933_v14  ;;  %1582 = vmatpush3.bf16.msra.mxu1 %v1922_v8  ;;  %p1807_p6 = pnand %p1806_p5, %p1800_p2 }
  0x34   :  { %1583 = vmatprep.subr.bf16.mxu1 %v1831_v0  ;;  %1506 = vmatprep.mubr.msk.f32.mxu1 %vm1832_vm0, %v1833_v1 }
  0x35   :  { %261 = vrot.lane.b32.xlu1 %v258_v17, %s1834_s1  ;;  %1586 = vmatprep.subr.bf16.mxu0 %v1831_v0 }
  0x37   :  { %1585 = vmatpush3.bf16.msra.mxu1 %v1933_v14 }
  0x38   :  { %1592 = vmatprep.subr.bf16.mxu1 %v1831_v0 }
  0x39   :  { %259 = vrot.lane.b32.xlu1 %v162_v16, %s1834_s1 }
  0xa7   :  { %v262_v42 = vpop.permute.xlu1 %261 }
  0xab   :  { %v260_v44 = vpop.permute.xlu1 %259 }
 0x101   :  { %v1475_v18 = vpop.f32.mrb[0].mxu0 }
 0x102   :  { %v152_v19 = vpop.f32.mrb[1].mxu0  ;;  %v1959_v21 = vadd.f32 %v1475_v18, %v1398_v20 }
 0x103   :  { %v1961_v25 = vadd.f32 %v1398_v20, %v152_v19 }
 0x105   :  { %v233_v22 = vpop.f32.mrb[0].mxu1 }
 0x106   :  { %v238_v23 = vrot.slane %v233_v22, 1  ;;  %v1486_v24 = vpop.f32.mrb[1].mxu1  ;;  %v241_v27 = vadd.f32 %v233_v22, %v1961_v25 }
 0x108   :  { %v242_v26 = vadd.f32 %v238_v23, %v1959_v21  ;;  %v1402_v31 = vmul.f32 -1.442695, %v241_v27 }
 0x10a   :  { %1627 = vtanh.f32 %v242_v26  ;;  %v1403_v30 = vmul.f32 -1.442695, %v242_v26 }
 0x10b   :  { %1629 = vtanh.f32 %v241_v27 }
 0x10c   :  { %1631 = vpow2.f32 %v1403_v30 }
 0x10d   :  { %1633 = vpow2.f32 %v1402_v31 }
 0x114   :  { %v1628_v28 = vpop.eup %1627 }
 0x115   :  { %271 = vrot.lane.b32.xlu0 %v1628_v28, %s1835_s17  ;;  %v1630_v29 = vpop.eup %1629 }
 0x116   :  { %v1632_v32 = vpop.eup %1631 }
 0x117   :  { %v250_v33 = vadd.f32 1.0, %v1632_v32  ;;  %v1634_v34 = vpop.eup %1633 }
 0x118   :  { %v249_v35 = vadd.f32 1.0, %v1634_v34 }
 0x119   :  { %269 = vrot.lane.b32.xlu0 %v1630_v29, %s1835_s17  ;;  %1635 = vrcp.f32 %v250_v33 }
 0x11a   :  { %1637 = vrcp.f32 %v249_v35 }
 0x123   :  { %v1636_v36 = vpop.eup %1635 }
 0x124   :  { %v1638_v39 = vpop.eup %1637  ;;  %v266_v43 = vmul.f32 %v1636_v36, %v262_v42 }
 0x125   :  { %v265_v47 = vmul.f32 %v1638_v39, %v260_v44 }
 0x187   :  { %v272_v37 = vpop.permute.xlu0 %271 }
 0x188   :  { %v276_v38 = vmul.f32 %v1636_v36, %v272_v37 }
 0x18a   :  { %281 = vrot.lane.b32.xlu0 %v276_v38, %s1834_s1 }
 0x18b   :  { %v270_v40 = vpop.permute.xlu0 %269 }
 0x18c   :  { %v275_v41 = vmul.f32 %v1638_v39, %v270_v40 }
 0x18e   :  { %279 = vrot.lane.b32.xlu1 %v275_v41, %s1834_s1 }
 0x1fc   :  { %v282_v45 = vpop.permute.xlu0 %281 }
 0x1fd   :  { %v286_v46 = vadd.f32 %v282_v45, %v266_v43 }
 0x1ff   :  { %1639 = vtanh.f32 %v286_v46  ;;  %v410_v18 = vrot.slane %v286_v46, 7 }
 0x200   :  { %v280_v48 = vpop.permute.xlu1 %279 }
 0x201   :  { %v285_v49 = vadd.f32 %v280_v48, %v265_v47 }
 0x203   :  { %1641 = vtanh.f32 %v285_v49  ;;  %v409_v20 = vrot.slane %v285_v49, 7 }
 0x209   :  { %v1640_v50 = vpop.eup %1639 }
 0x20a   :  { %293 = vrot.lane.b32.xlu0 %v1640_v50, %s1835_s17 }
 0x20d   :  { %v1642_v51 = vpop.eup %1641 }
 0x20e   :  { %291 = vrot.lane.b32.xlu1 %v1642_v51, %s1835_s17 }
 0x27c   :  { %v294_v52 = vpop.permute.xlu0 %293 }
 0x27d   :  { %v1971_v53 = vmul.f32 %v1636_v36, %v294_v52 }
 0x27f   :  { %v310_v55 = vrot.slane %v1971_v53, 7 }
 0x280   :  { %v292_v54 = vpop.permute.xlu1 %291 }
 0x281   :  { %v1974_v56 = vmul.f32 %v1638_v39, %v292_v54 }
 0x283   :  { %v312_v57 = vsel %vm311_vm4, %v310_v55, %v1974_v56 }
 0x284   :  { %313 = vrot.lane.b32.xlu0 %v312_v57, %s1834_s1 }
 0x2f6   :  { %v314_v58 = vpop.permute.xlu0 %313 }
 0x2f7   :  { %1496 = vmatmul.mubr.msk.f32.vlgmr.msra.gmra.mrb[2].mxu0 %vm163_vm3, %v314_v58 }
 0x2f8   :  { %1588 = vmatpush3.bf16.msra.mxu0 %v1922_v8  ;;  %1517 = vmatprep.mubr.msk.f32.mxu0 %vm1832_vm0, %v1833_v1 }
 0x2f9   :  { %1589 = vmatprep.subr.bf16.mxu0 %v1831_v0 }
 0x2fc   :  { %1591 = vmatpush3.bf16.msra.mxu0 %v1933_v14 }
 0x2fd   :  { %1598 = vmatprep.subr.bf16.mxu0 %v1831_v0 }
 0x3ca   :  { %v383_v59 = vpop.f32.mrb[2].mxu0 }
 0x3cb   :  { %v388_v60 = vrot.slane %v383_v59, 7  ;;  %v392_v61 = vadd.f32 %v383_v59, %v1959_v21  ;;  %v1497_v62 = vpop.f32.mrb[3].mxu0 }
 0x3cd   :  { %v391_v63 = vadd.f32 %v388_v60, %v1961_v25  ;;  %1643 = vtanh.f32 %v392_v61  ;;  %v1406_v4 = vmul.f32 -1.442695, %v392_v61 }
 0x3cf   :  { %1645 = vtanh.f32 %v391_v63  ;;  %v1405_v5 = vmul.f32 -1.442695, %v391_v63 }
 0x3d0   :  { %1647 = vpow2.f32 %v1406_v4 }
 0x3d1   :  { %1649 = vpow2.f32 %v1405_v5 }
 0x3d7   :  { %v1644_v2 = vpop.eup %1643 }
 0x3d8   :  { %419 = vrot.lane.b32.xlu0 %v1644_v2, %s1835_s17 }
 0x3d9   :  { %v1646_v3 = vpop.eup %1645 }
 0x3da   :  { %417 = vrot.lane.b32.xlu1 %v1646_v3, %s1835_s17  ;;  %v1648_v6 = vpop.eup %1647 }
 0x3db   :  { %v1650_v7 = vpop.eup %1649  ;;  %v400_v9 = vadd.f32 1.0, %v1648_v6 }
 0x3dc   :  { %v399_v10 = vadd.f32 1.0, %v1650_v7 }
 0x3dd   :  { %1651 = vrcp.f32 %v400_v9 }
 0x3de   :  { %1653 = vrcp.f32 %v399_v10 }
 0x3e7   :  { %v1652_v11 = vpop.eup %1651 }
 0x3e8   :  { %v1654_v15 = vpop.eup %1653  ;;  %v414_v19 = vmul.f32 %v1652_v11, %v410_v18 }
 0x3e9   :  { %v413_v24 = vmul.f32 %v1654_v15, %v409_v20 }
 0x44a   :  { %v420_v12 = vpop.permute.xlu0 %419 }
 0x44b   :  { %v424_v13 = vmul.f32 %v1652_v11, %v420_v12 }
 0x44c   :  { %v418_v16 = vpop.permute.xlu1 %417 }
 0x44d   :  { %429 = vrot.lane.b32.xlu0 %v424_v13, %s1834_s1  ;;  %v423_v17 = vmul.f32 %v1654_v15, %v418_v16 }
 0x44f   :  { %427 = vrot.lane.b32.xlu1 %v423_v17, %s1834_s1 }
 0x4bf   :  { %v430_v22 = vpop.permute.xlu0 %429 }
 0x4c0   :  { %v434_v23 = vadd.f32 %v430_v22, %v414_v19 }
 0x4c1   :  { %v428_v26 = vpop.permute.xlu1 %427 }
 0x4c2   :  { %1655 = vtanh.f32 %v434_v23  ;;  %v433_v27 = vadd.f32 %v428_v26, %v413_v24  ;;  %v558_v60 = vrot.slane %v434_v23, 7 }
 0x4c4   :  { %1657 = vtanh.f32 %v433_v27  ;;  %v557_v59 = vrot.slane %v433_v27, 7 }
 0x4cc   :  { %v1656_v28 = vpop.eup %1655 }
 0x4cd   :  { %441 = vrot.lane.b32.xlu0 %v1656_v28, %s1835_s17 }
 0x4ce   :  { %v1658_v29 = vpop.eup %1657 }
 0x4cf   :  { %439 = vrot.lane.b32.xlu1 %v1658_v29, %s1835_s17 }
 0x53f   :  { %v442_v30 = vpop.permute.xlu0 %441 }
 0x540   :  { %v1996_v33 = vmul.f32 %v1652_v11, %v442_v30 }
 0x541   :  { %v440_v31 = vpop.permute.xlu1 %439 }
 0x542   :  { %v1994_v32 = vmul.f32 %v1654_v15, %v440_v31 }
 0x544   :  { %v458_v34 = vrot.slane %v1994_v32, 1 }
 0x546   :  { %v459_v35 = vsel %vm311_vm4, %v1996_v33, %v458_v34 }
 0x547   :  { %460 = vrot.lane.b32.xlu1 %v459_v35, %s1834_s1 }
 0x5b9   :  { %v461_v36 = vpop.permute.xlu1 %460 }
 0x5ba   :  { %1507 = vmatmul.mubr.msk.f32.vlgmr.msra.gmra.mrb[2].mxu1 %vm163_vm3, %v461_v36 }
 0x5bb   :  { %1594 = vmatpush3.bf16.msra.mxu1 %v1922_v8  ;;  %1528 = vmatprep.mubr.msk.f32.mxu1 %vm1832_vm0, %v1833_v1 }
 0x5bc   :  { %1595 = vmatprep.subr.bf16.mxu1 %v1831_v0 }
 0x5bf   :  { %1597 = vmatpush3.bf16.msra.mxu1 %v1933_v14 }
 0x5c0   :  { %1604 = vmatprep.subr.bf16.mxu1 %v1831_v0 }
 0x68d   :  { %v530_v37 = vpop.f32.mrb[2].mxu1 }
 0x68e   :  { %v535_v38 = vrot.slane %v530_v37, 6  ;;  %v536_v39 = vrot.slane %v530_v37, 7  ;;  %v1508_v40 = vpop.f32.mrb[3].mxu1 }
 0x690   :  { %v539_v41 = vadd.f32 %v535_v38, %v1961_v25  ;;  %v540_v42 = vadd.f32 %v536_v39, %v1959_v21 }
 0x692   :  { %1659 = vtanh.f32 %v539_v41  ;;  %v1408_v45 = vmul.f32 -1.442695, %v539_v41  ;;  %v1409_v46 = vmul.f32 -1.442695, %v540_v42 }
 0x693   :  { %1661 = vtanh.f32 %v540_v42 }
 0x694   :  { %1663 = vpow2.f32 %v1408_v45 }
 0x695   :  { %1665 = vpow2.f32 %v1409_v46 }
 0x69c   :  { %v1660_v43 = vpop.eup %1659 }
 0x69d   :  { %v1662_v44 = vpop.eup %1661  ;;  %565 = vrot.lane.b32.xlu0 %v1660_v43, %s1835_s17 }
 0x69e   :  { %567 = vrot.lane.b32.xlu1 %v1662_v44, %s1835_s17  ;;  %v1664_v47 = vpop.eup %1663 }
 0x69f   :  { %v1666_v48 = vpop.eup %1665  ;;  %v547_v49 = vadd.f32 1.0, %v1664_v47 }
 0x6a0   :  { %v548_v50 = vadd.f32 1.0, %v1666_v48 }
 0x6a1   :  { %1667 = vrcp.f32 %v547_v49 }
 0x6a2   :  { %1669 = vrcp.f32 %v548_v50 }
 0x6ab   :  { %v1668_v51 = vpop.eup %1667 }
 0x6ac   :  { %v1670_v54 = vpop.eup %1669  ;;  %v561_v61 = vmul.f32 %v1668_v51, %v557_v59 }
 0x6ad   :  { %v562_v62 = vmul.f32 %v1670_v54, %v558_v60 }
 0x70f   :  { %v566_v52 = vpop.permute.xlu0 %565 }
 0x710   :  { %v568_v55 = vpop.permute.xlu1 %567  ;;  %v571_v57 = vmul.f32 %v1668_v51, %v566_v52 }
 0x711   :  { %v572_v58 = vmul.f32 %v1670_v54, %v568_v55 }
 0x712   :  { %575 = vrot.lane.b32.xlu0 %v571_v57, %s1834_s1 }
 0x713   :  { %577 = vrot.lane.b32.xlu1 %v572_v58, %s1834_s1 }
 0x784   :  { %v576_v63 = vpop.permute.xlu0 %575 }
 0x785   :  { %v578_v2 = vpop.permute.xlu1 %577  ;;  %v581_v3 = vadd.f32 %v576_v63, %v561_v61 }
 0x786   :  { %v582_v4 = vadd.f32 %v578_v2, %v562_v62 }
 0x787   :  { %1671 = vtanh.f32 %v581_v3  ;;  %v706_v41 = vrot.slane %v581_v3, 7 }
 0x788   :  { %1673 = vtanh.f32 %v582_v4  ;;  %v707_v42 = vrot.slane %v582_v4, 7 }
 0x791   :  { %v1672_v5 = vpop.eup %1671 }
 0x792   :  { %v1674_v6 = vpop.eup %1673  ;;  %587 = vrot.lane.b32.xlu0 %v1672_v5, %s1835_s17 }
 0x793   :  { %589 = vrot.lane.b32.xlu1 %v1674_v6, %s1835_s17 }
 0x804   :  { %v588_v7 = vpop.permute.xlu0 %587 }
 0x805   :  { %v590_v9 = vpop.permute.xlu1 %589  ;;  %v2017_v10 = vmul.f32 %v1668_v51, %v588_v7 }
 0x806   :  { %v2019_v11 = vmul.f32 %v1670_v54, %v590_v9 }
 0x807   :  { %v606_v12 = vrot.slane %v2017_v10, 2 }
 0x808   :  { %v607_v13 = vrot.slane %v2019_v11, 1 }
 0x80a   :  { %v608_v15 = vsel %vm311_vm4, %v607_v13, %v606_v12 }
 0x80b   :  { %609 = vrot.lane.b32.xlu0 %v608_v15, %s1834_s1 }
 0x87d   :  { %v610_v16 = vpop.permute.xlu0 %609 }
 0x87e   :  { %1518 = vmatmul.mubr.msk.f32.vlgmr.msra.gmra.mrb[4].mxu0 %vm163_vm3, %v610_v16 }
 0x87f   :  { %1600 = vmatpush3.bf16.msra.mxu0 %v1922_v8  ;;  %1539 = vmatprep.mubr.msk.f32.mxu0 %vm1832_vm0, %v1833_v1 }
 0x880   :  { %1601 = vmatprep.subr.bf16.mxu0 %v1831_v0 }
 0x883   :  { %1603 = vmatpush3.bf16.msra.mxu0 %v1933_v14 }
 0x884   :  { %1610 = vmatprep.subr.bf16.mxu0 %v1831_v0 }
 0x951   :  { %v679_v17 = vpop.f32.mrb[4].mxu0 }
 0x952   :  { %v684_v18 = vrot.slane %v679_v17, 5  ;;  %v685_v19 = vrot.slane %v679_v17, 6  ;;  %v1519_v20 = vpop.f32.mrb[5].mxu0 }
 0x954   :  { %v688_v22 = vadd.f32 %v684_v18, %v1961_v25  ;;  %v689_v23 = vadd.f32 %v685_v19, %v1959_v21 }
 0x956   :  { %1675 = vtanh.f32 %v688_v22  ;;  %v1411_v27 = vmul.f32 -1.442695, %v688_v22  ;;  %v1412_v28 = vmul.f32 -1.442695, %v689_v23 }
 0x957   :  { %1677 = vtanh.f32 %v689_v23 }
 0x958   :  { %1679 = vpow2.f32 %v1411_v27 }
 0x959   :  { %1681 = vpow2.f32 %v1412_v28 }
 0x960   :  { %v1676_v24 = vpop.eup %1675 }
 0x961   :  { %v1678_v26 = vpop.eup %1677  ;;  %714 = vrot.lane.b32.xlu1 %v1676_v24, %s1835_s17 }
 0x962   :  { %716 = vrot.lane.b32.xlu0 %v1678_v26, %s1835_s17  ;;  %v1680_v29 = vpop.eup %1679 }
 0x963   :  { %v1682_v30 = vpop.eup %1681  ;;  %v696_v31 = vadd.f32 1.0, %v1680_v29 }
 0x964   :  { %v697_v34 = vadd.f32 1.0, %v1682_v30 }
 0x965   :  { %1683 = vrcp.f32 %v696_v31 }
 0x966   :  { %1685 = vrcp.f32 %v697_v34 }
 0x96f   :  { %v1684_v35 = vpop.eup %1683 }
 0x970   :  { %v1686_v37 = vpop.eup %1685  ;;  %v710_v43 = vmul.f32 %v1684_v35, %v706_v41 }
 0x971   :  { %v711_v44 = vmul.f32 %v1686_v37, %v707_v42 }
 0x9d3   :  { %v715_v36 = vpop.permute.xlu1 %714 }
 0x9d4   :  { %v717_v38 = vpop.permute.xlu0 %716  ;;  %v720_v39 = vmul.f32 %v1684_v35, %v715_v36 }
 0x9d5   :  { %v721_v40 = vmul.f32 %v1686_v37, %v717_v38 }
 0x9d6   :  { %724 = vrot.lane.b32.xlu1 %v720_v39, %s1834_s1 }
 0x9d7   :  { %726 = vrot.lane.b32.xlu0 %v721_v40, %s1834_s1 }
 0xa48   :  { %v725_v45 = vpop.permute.xlu1 %724 }
 0xa49   :  { %v727_v46 = vpop.permute.xlu0 %726  ;;  %v730_v47 = vadd.f32 %v725_v45, %v710_v43 }
 0xa4a   :  { %v731_v48 = vadd.f32 %v727_v46, %v711_v44 }
 0xa4b   :  { %1687 = vtanh.f32 %v730_v47  ;;  %v855_v24 = vrot.slane %v730_v47, 7 }
 0xa4c   :  { %1689 = vtanh.f32 %v731_v48  ;;  %v856_v26 = vrot.slane %v731_v48, 7 }
 0xa55   :  { %v1688_v49 = vpop.eup %1687 }
 0xa56   :  { %v1690_v50 = vpop.eup %1689  ;;  %736 = vrot.lane.b32.xlu1 %v1688_v49, %s1835_s17 }
 0xa57   :  { %738 = vrot.lane.b32.xlu0 %v1690_v50, %s1835_s17 }
 0xac8   :  { %v737_v51 = vpop.permute.xlu1 %736 }
 0xac9   :  { %v739_v52 = vpop.permute.xlu0 %738  ;;  %v2040_v54 = vmul.f32 %v1684_v35, %v737_v51 }
 0xaca   :  { %v2042_v55 = vmul.f32 %v1686_v37, %v739_v52 }
 0xacb   :  { %v755_v57 = vrot.slane %v2040_v54, 3 }
 0xacc   :  { %v756_v58 = vrot.slane %v2042_v55, 2 }
 0xace   :  { %v757_v59 = vsel %vm311_vm4, %v756_v58, %v755_v57 }
 0xacf   :  { %758 = vrot.lane.b32.xlu1 %v757_v59, %s1834_s1 }
 0xb41   :  { %v759_v60 = vpop.permute.xlu1 %758 }
 0xb42   :  { %1529 = vmatmul.mubr.msk.f32.vlgmr.msra.gmra.mrb[4].mxu1 %vm163_vm3, %v759_v60 }
 0xb43   :  { %1606 = vmatpush3.bf16.msra.mxu1 %v1922_v8  ;;  %1550 = vmatprep.mubr.msk.f32.mxu1 %vm1832_vm0, %v1833_v1 }
 0xb44   :  { %1607 = vmatprep.subr.bf16.mxu1 %v1831_v0 }
 0xb47   :  { %1609 = vmatpush3.bf16.msra.mxu1 %v1933_v14 }
 0xc15   :  { %v828_v61 = vpop.f32.mrb[4].mxu1 }
 0xc16   :  { %v833_v62 = vrot.slane %v828_v61, 4  ;;  %v834_v63 = vrot.slane %v828_v61, 5  ;;  %v1530_v2 = vpop.f32.mrb[5].mxu1 }
 0xc18   :  { %v837_v3 = vadd.f32 %v833_v62, %v1961_v25  ;;  %v838_v4 = vadd.f32 %v834_v63, %v1959_v21 }
 0xc1a   :  { %1691 = vtanh.f32 %v837_v3  ;;  %v1414_v7 = vmul.f32 -1.442695, %v837_v3  ;;  %v1415_v9 = vmul.f32 -1.442695, %v838_v4 }
 0xc1b   :  { %1693 = vtanh.f32 %v838_v4 }
 0xc1c   :  { %1695 = vpow2.f32 %v1414_v7 }
 0xc1d   :  { %1697 = vpow2.f32 %v1415_v9 }
 0xc24   :  { %v1692_v5 = vpop.eup %1691 }
 0xc25   :  { %v1694_v6 = vpop.eup %1693  ;;  %863 = vrot.lane.b32.xlu0 %v1692_v5, %s1835_s17 }
 0xc26   :  { %865 = vrot.lane.b32.xlu1 %v1694_v6, %s1835_s17  ;;  %v1696_v12 = vpop.eup %1695 }
 0xc27   :  { %v1698_v13 = vpop.eup %1697  ;;  %v845_v15 = vadd.f32 1.0, %v1696_v12 }
 0xc28   :  { %v846_v16 = vadd.f32 1.0, %v1698_v13 }
 0xc29   :  { %1699 = vrcp.f32 %v845_v15 }
 0xc2a   :  { %1701 = vrcp.f32 %v846_v16 }
 0xc33   :  { %v1700_v17 = vpop.eup %1699 }
 0xc34   :  { %v1702_v19 = vpop.eup %1701  ;;  %v859_v27 = vmul.f32 %v1700_v17, %v855_v24 }
 0xc35   :  { %v860_v28 = vmul.f32 %v1702_v19, %v856_v26 }
 0xc97   :  { %v864_v18 = vpop.permute.xlu0 %863 }
 0xc98   :  { %v866_v20 = vpop.permute.xlu1 %865  ;;  %v869_v22 = vmul.f32 %v1700_v17, %v864_v18 }
 0xc99   :  { %v870_v23 = vmul.f32 %v1702_v19, %v866_v20 }
 0xc9a   :  { %873 = vrot.lane.b32.xlu0 %v869_v22, %s1834_s1 }
 0xc9b   :  { %875 = vrot.lane.b32.xlu1 %v870_v23, %s1834_s1 }
 0xd0c   :  { %v874_v29 = vpop.permute.xlu0 %873 }
 0xd0d   :  { %v876_v30 = vpop.permute.xlu1 %875  ;;  %v879_v31 = vadd.f32 %v874_v29, %v859_v27 }
 0xd0e   :  { %v880_v34 = vadd.f32 %v876_v30, %v860_v28 }
 0xd0f   :  { %1703 = vtanh.f32 %v879_v31  ;;  %v1004_v3 = vrot.slane %v879_v31, 7 }
 0xd10   :  { %1705 = vtanh.f32 %v880_v34  ;;  %v1005_v4 = vrot.slane %v880_v34, 7 }
 0xd19   :  { %v1704_v35 = vpop.eup %1703 }
 0xd1a   :  { %v1706_v36 = vpop.eup %1705  ;;  %885 = vrot.lane.b32.xlu0 %v1704_v35, %s1835_s17 }
 0xd1b   :  { %887 = vrot.lane.b32.xlu1 %v1706_v36, %s1835_s17 }
 0xd8c   :  { %v886_v37 = vpop.permute.xlu0 %885 }
 0xd8d   :  { %v888_v38 = vpop.permute.xlu1 %887  ;;  %v2062_v39 = vmul.f32 %v1700_v17, %v886_v37 }
 0xd8e   :  { %v2064_v40 = vmul.f32 %v1702_v19, %v888_v38 }
 0xd8f   :  { %v904_v41 = vrot.slane %v2062_v39, 4 }
 0xd90   :  { %v905_v42 = vrot.slane %v2064_v40, 3 }
 0xd92   :  { %v906_v43 = vsel %vm311_vm4, %v905_v42, %v904_v41 }
 0xd93   :  { %907 = vrot.lane.b32.xlu0 %v906_v43, %s1834_s1 }
 0xe05   :  { %v908_v44 = vpop.permute.xlu0 %907 }
 0xe06   :  { %1540 = vmatmul.mubr.msk.f32.vlgmr.msra.gmra.mrb[6].mxu0 %vm163_vm3, %v908_v44 }
 0xe07   :  { %1612 = vmatpush3.bf16.msra.mxu0 %v1922_v8  ;;  %1561 = vmatprep.mubr.msk.f32.mxu0 %vm1832_vm0, %v1833_v1 }
 0xe08   :  { %1613 = vmatprep.subr.bf16.mxu0 %v1831_v0 }
 0xe0b   :  { %1615 = vmatpush3.bf16.msra.mxu0 %v1933_v14 }
 0xed9   :  { %v977_v45 = vpop.f32.mrb[6].mxu0 }
 0xeda   :  { %v982_v46 = vrot.slane %v977_v45, 3  ;;  %v983_v47 = vrot.slane %v977_v45, 4  ;;  %v1541_v48 = vpop.f32.mrb[7].mxu0 }
 0xedc   :  { %v986_v49 = vadd.f32 %v982_v46, %v1961_v25  ;;  %v987_v50 = vadd.f32 %v983_v47, %v1959_v21 }
 0xede   :  { %1707 = vtanh.f32 %v986_v49  ;;  %v1417_v1 = vmul.f32 -1.442695, %v986_v49  ;;  %v1418_v0 = vmul.f32 -1.442695, %v987_v50 }
 0xedf   :  { %1709 = vtanh.f32 %v987_v50 }
 0xee0   :  { %1711 = vpow2.f32 %v1417_v1 }
 0xee1   :  { %1713 = vpow2.f32 %v1418_v0 }
 0xee8   :  { %v1708_v51 = vpop.eup %1707 }
 0xee9   :  { %v1710_v52 = vpop.eup %1709  ;;  %1012 = vrot.lane.b32.xlu1 %v1708_v51, %s1835_s17 }
 0xeea   :  { %1014 = vrot.lane.b32.xlu0 %v1710_v52, %s1835_s17  ;;  %v1712_v8 = vpop.eup %1711 }
 0xeeb   :  { %v1714_v14 = vpop.eup %1713  ;;  %v994_v57 = vadd.f32 1.0, %v1712_v8 }
 0xeec   :  { %v995_v58 = vadd.f32 1.0, %v1714_v14 }
 0xeed   :  { %1715 = vrcp.f32 %v994_v57 }
 0xeee   :  { %1717 = vrcp.f32 %v995_v58 }
 0xef7   :  { %v1716_v59 = vpop.eup %1715 }
 0xef8   :  { %v1718_v61 = vpop.eup %1717  ;;  %v1008_v5 = vmul.f32 %v1716_v59, %v1004_v3 }
 0xef9   :  { %v1009_v6 = vmul.f32 %v1718_v61, %v1005_v4 }
 0xf5b   :  { %v1013_v60 = vpop.permute.xlu1 %1012 }
 0xf5c   :  { %v1015_v62 = vpop.permute.xlu0 %1014  ;;  %v1018_v63 = vmul.f32 %v1716_v59, %v1013_v60 }
 0xf5d   :  { %v1019_v2 = vmul.f32 %v1718_v61, %v1015_v62 }
 0xf5e   :  { %1022 = vrot.lane.b32.xlu1 %v1018_v63, %s1834_s1 }
 0xf5f   :  { %1024 = vrot.lane.b32.xlu0 %v1019_v2, %s1834_s1 }
 0xfd0   :  { %v1023_v7 = vpop.permute.xlu1 %1022 }
 0xfd1   :  { %v1025_v9 = vpop.permute.xlu0 %1024  ;;  %v1028_v12 = vadd.f32 %v1023_v7, %v1008_v5 }
 0xfd2   :  { %v1029_v13 = vadd.f32 %v1025_v9, %v1009_v6 }
 0xfd3   :  { %1719 = vtanh.f32 %v1028_v12  ;;  %v1153_v51 = vrot.slane %v1028_v12, 7 }
 0xfd4   :  { %1721 = vtanh.f32 %v1029_v13  ;;  %v1154_v52 = vrot.slane %v1029_v13, 7 }
 0xfdd   :  { %v1720_v15 = vpop.eup %1719 }
 0xfde   :  { %v1722_v16 = vpop.eup %1721  ;;  %1034 = vrot.lane.b32.xlu1 %v1720_v15, %s1835_s17 }
 0xfdf   :  { %1036 = vrot.lane.b32.xlu0 %v1722_v16, %s1835_s17 }
0x1050   :  { %v1035_v17 = vpop.permute.xlu1 %1034 }
0x1051   :  { %v1037_v18 = vpop.permute.xlu0 %1036  ;;  %v2084_v19 = vmul.f32 %v1716_v59, %v1035_v17 }
0x1052   :  { %v2086_v20 = vmul.f32 %v1718_v61, %v1037_v18 }
0x1053   :  { %v1053_v22 = vrot.slane %v2084_v19, 5 }
0x1054   :  { %v1054_v23 = vrot.slane %v2086_v20, 4 }
0x1056   :  { %v1055_v24 = vsel %vm311_vm4, %v1054_v23, %v1053_v22 }
0x1057   :  { %1056 = vrot.lane.b32.xlu1 %v1055_v24, %s1834_s1 }
0x10c9   :  { %v1057_v26 = vpop.permute.xlu1 %1056 }
0x10ca   :  { %1551 = vmatmul.mubr.msk.f32.vlgmr.msra.gmra.mrb[6].mxu1 %vm163_vm3, %v1057_v26 }
0x119d   :  { %v1126_v27 = vpop.f32.mrb[6].mxu1 }
0x119e   :  { %v1131_v28 = vrot.slane %v1126_v27, 2  ;;  %v1132_v29 = vrot.slane %v1126_v27, 3  ;;  %v1552_v30 = vpop.f32.mrb[7].mxu1 }
0x11a0   :  { %v1135_v31 = vadd.f32 %v1131_v28, %v1961_v25  ;;  %v1136_v34 = vadd.f32 %v1132_v29, %v1959_v21 }
0x11a2   :  { %1723 = vtanh.f32 %v1135_v31  ;;  %v1420_v37 = vmul.f32 -1.442695, %v1135_v31  ;;  %v1421_v38 = vmul.f32 -1.442695, %v1136_v34 }
0x11a3   :  { %1725 = vtanh.f32 %v1136_v34 }
0x11a4   :  { %1727 = vpow2.f32 %v1420_v37 }
0x11a5   :  { %1729 = vpow2.f32 %v1421_v38 }
0x11ac   :  { %v1724_v35 = vpop.eup %1723 }
0x11ad   :  { %v1726_v36 = vpop.eup %1725  ;;  %1161 = vrot.lane.b32.xlu0 %v1724_v35, %s1835_s17 }
0x11ae   :  { %1163 = vrot.lane.b32.xlu1 %v1726_v36, %s1835_s17  ;;  %v1728_v41 = vpop.eup %1727 }
0x11af   :  { %v1730_v42 = vpop.eup %1729  ;;  %v1143_v43 = vadd.f32 1.0, %v1728_v41 }
0x11b0   :  { %v1144_v44 = vadd.f32 1.0, %v1730_v42 }
0x11b1   :  { %1731 = vrcp.f32 %v1143_v43 }
0x11b2   :  { %1733 = vrcp.f32 %v1144_v44 }
0x11bb   :  { %v1732_v45 = vpop.eup %1731 }
0x11bc   :  { %v1734_v47 = vpop.eup %1733  ;;  %v1157_v1 = vmul.f32 %v1732_v45, %v1153_v51 }
0x11bd   :  { %v1158_v0 = vmul.f32 %v1734_v47, %v1154_v52 }
0x121f   :  { %v1162_v46 = vpop.permute.xlu0 %1161 }
0x1220   :  { %v1164_v48 = vpop.permute.xlu1 %1163  ;;  %v1167_v49 = vmul.f32 %v1732_v45, %v1162_v46 }
0x1221   :  { %v1168_v50 = vmul.f32 %v1734_v47, %v1164_v48 }
0x1222   :  { %1171 = vrot.lane.b32.xlu0 %v1167_v49, %s1834_s1 }
0x1223   :  { %1173 = vrot.lane.b32.xlu1 %v1168_v50, %s1834_s1 }
0x1294   :  { %v1172_v8 = vpop.permute.xlu0 %1171 }
0x1295   :  { %v1174_v14 = vpop.permute.xlu1 %1173  ;;  %v1177_v57 = vadd.f32 %v1172_v8, %v1157_v1 }
0x1296   :  { %v1178_v58 = vadd.f32 %v1174_v14, %v1158_v0 }
0x1297   :  { %1735 = vtanh.f32 %v1177_v57  ;;  %v1302_v35 = vrot.slane %v1177_v57, 7 }
0x1298   :  { %1737 = vtanh.f32 %v1178_v58  ;;  %v1303_v36 = vrot.slane %v1178_v58, 7 }
0x12a1   :  { %v1736_v59 = vpop.eup %1735 }
0x12a2   :  { %v1738_v60 = vpop.eup %1737  ;;  %1183 = vrot.lane.b32.xlu0 %v1736_v59, %s1835_s17 }
0x12a3   :  { %1185 = vrot.lane.b32.xlu1 %v1738_v60, %s1835_s17 }
0x1314   :  { %v1184_v61 = vpop.permute.xlu0 %1183 }
0x1315   :  { %v1186_v62 = vpop.permute.xlu1 %1185  ;;  %v2101_v63 = vmul.f32 %v1732_v45, %v1184_v61 }
0x1316   :  { %v1190_v2 = vmul.f32 %v1734_v47, %v1186_v62 }
0x1317   :  { %v1202_v3 = vrot.slane %v2101_v63, 6 }
0x1318   :  { %v1203_v4 = vrot.slane %v1190_v2, 5 }
0x131a   :  { %v1204_v5 = vsel %vm311_vm4, %v1203_v4, %v1202_v3 }
0x131b   :  { %1205 = vrot.lane.b32.xlu0 %v1204_v5, %s1834_s1 }
0x138d   :  { %v1206_v6 = vpop.permute.xlu0 %1205 }
0x138e   :  { %1562 = vmatmul.mubr.msk.f32.vlgmr.msra.gmra.mrb[8].mxu0 %vm163_vm3, %v1206_v6 }
0x1461   :  { %v1275_v7 = vpop.f32.mrb[8].mxu0 }
0x1462   :  { %v1280_v9 = vrot.slane %v1275_v7, 1  ;;  %v1281_v12 = vrot.slane %v1275_v7, 2  ;;  %v1563_v13 = vpop.f32.mrb[9].mxu0 }
0x1464   :  { %v1284_v15 = vadd.f32 %v1280_v9, %v1961_v25  ;;  %v1285_v16 = vadd.f32 %v1281_v12, %v1959_v21 }
0x1466   :  { %1739 = vtanh.f32 %v1284_v15  ;;  %v1423_v22 = vmul.f32 -1.442695, %v1284_v15  ;;  %v1424_v23 = vmul.f32 -1.442695, %v1285_v16 }
0x1467   :  { %1741 = vtanh.f32 %v1285_v16 }
0x1468   :  { %1743 = vpow2.f32 %v1423_v22 }
0x1469   :  { %1745 = vpow2.f32 %v1424_v23 }
0x1470   :  { %v1740_v17 = vpop.eup %1739 }
0x1471   :  { %v1742_v18 = vpop.eup %1741  ;;  %1310 = vrot.lane.b32.xlu0 %v1740_v17, %s1835_s17 }
0x1472   :  { %1312 = vrot.lane.b32.xlu1 %v1742_v18, %s1835_s17  ;;  %v1744_v24 = vpop.eup %1743 }
0x1473   :  { %v1746_v26 = vpop.eup %1745  ;;  %v1292_v27 = vadd.f32 1.0, %v1744_v24 }
0x1474   :  { %v1293_v28 = vadd.f32 1.0, %v1746_v26 }
0x1475   :  { %1747 = vrcp.f32 %v1292_v27 }
0x1476   :  { %1749 = vrcp.f32 %v1293_v28 }
0x147f   :  { %v1748_v25 = vpop.eup %1747 }
0x1480   :  { %v1750_v29 = vpop.eup %1749  ;;  %v1306_v37 = vmul.f32 %v1748_v25, %v1302_v35 }
0x1481   :  { %v1307_v38 = vmul.f32 %v1750_v29, %v1303_v36 }
0x14e3   :  { %v1311_v21 = vpop.permute.xlu0 %1310 }
0x14e4   :  { %v1313_v30 = vpop.permute.xlu1 %1312  ;;  %v1316_v31 = vmul.f32 %v1748_v25, %v1311_v21 }
0x14e5   :  { %v1317_v34 = vmul.f32 %v1750_v29, %v1313_v30 }
0x14e6   :  { %1320 = vrot.lane.b32.xlu0 %v1316_v31, %s1834_s1 }
0x14e7   :  { %1322 = vrot.lane.b32.xlu1 %v1317_v34, %s1834_s1 }
0x1558   :  { %v1321_v41 = vpop.permute.xlu0 %1320 }
0x1559   :  { %v1323_v42 = vpop.permute.xlu1 %1322  ;;  %v1326_v43 = vadd.f32 %v1321_v41, %v1306_v37 }
0x155a   :  { %v1327_v44 = vadd.f32 %v1323_v42, %v1307_v38 }
0x155b   :  { %1751 = vtanh.f32 %v1326_v43 }
0x155c   :  { %1753 = vtanh.f32 %v1327_v44 }
0x1565   :  { %v1752_v45 = vpop.eup %1751 }
0x1566   :  { %v1754_v46 = vpop.eup %1753  ;;  %1332 = vrot.lane.b32.xlu0 %v1752_v45, %s1835_s17 }
0x1567   :  { %1334 = vrot.lane.b32.xlu1 %v1754_v46, %s1835_s17 }
0x156a   :  { %303 = vrot.lane.b32.xlu0 %v1971_v53, %s1834_s1 }
0x156b   :  { %301 = vrot.lane.b32.xlu1 %v1974_v56, %s1834_s1 }
0x156e   :  { %451 = vrot.lane.b32.xlu0 %v1996_v33, %s1834_s1 }
0x156f   :  { %449 = vrot.lane.b32.xlu1 %v1994_v32, %s1834_s1 }
0x1572   :  { %599 = vrot.lane.b32.xlu0 %v2019_v11, %s1834_s1 }
0x1573   :  { %597 = vrot.lane.b32.xlu1 %v2017_v10, %s1834_s1 }
0x1576   :  { %748 = vrot.lane.b32.xlu0 %v2042_v55, %s1834_s1 }
0x1577   :  { %746 = vrot.lane.b32.xlu1 %v2040_v54, %s1834_s1 }
0x157a   :  { %897 = vrot.lane.b32.xlu0 %v2064_v40, %s1834_s1 }
0x157b   :  { %895 = vrot.lane.b32.xlu1 %v2062_v39, %s1834_s1  ;;  %v1359_v39 = vrot.slane %v1327_v44, 7 }
0x157e   :  { %1046 = vrot.lane.b32.xlu0 %v2086_v20, %s1834_s1 }
0x157f   :  { %1044 = vrot.lane.b32.xlu1 %v2084_v19, %s1834_s1 }
0x1582   :  { %1195 = vrot.lane.b32.xlu0 %v1190_v2, %s1834_s1 }
0x1583   :  { %1193 = vrot.lane.b32.xlu1 %v2101_v63, %s1834_s1 }
0x15d8   :  { %v1333_v53 = vpop.permute.xlu0 %1332 }
0x15d9   :  { %v1335_v56 = vpop.permute.xlu1 %1334  ;;  %v1338_v32 = vmul.f32 %v1748_v25, %v1333_v53 }
0x15da   :  { %v1339_v33 = vmul.f32 %v1750_v29, %v1335_v56 }
0x15db   :  { %1342 = vrot.lane.b32.xlu1 %v1338_v32, %s1834_s1 }
0x15dc   :  { %1344 = vrot.lane.b32.xlu0 %v1339_v33, %s1834_s1  ;;  %v304_v10 = vpop.permute.xlu0 %303  ;;  %v1351_v11 = vrot.slane %v1339_v33, 7 }
0x15dd   :  { %v302_v54 = vpop.permute.xlu1 %301  ;;  %309 = vst.msk [vmem:[#allocation9 + $0x8] sm:$0x1] %vm307_vm5, %v304_v10 }
0x15de   :  { %308 = vst.msk [vmem:[#allocation9] sm:$0x1] %vm307_vm5, %v302_v54 }
0x15df   :  { %1352 = vrot.lane.b32.xlu1 %v1351_v11, %s1834_s1 }
0x15e0   :  { %1360 = vrot.lane.b32.xlu0 %v1326_v43, %s1836_s5  ;;  %v452_v55 = vpop.permute.xlu0 %451 }
0x15e1   :  { %v450_v40 = vpop.permute.xlu1 %449  ;;  %457 = vst.msk [vmem:[#allocation9 + $0x8] sm:$0x2] %vm455_vm6, %v452_v55 }
0x15e2   :  { %456 = vst.msk [vmem:[#allocation9] sm:$0x2] %vm455_vm6, %v450_v40 }
0x15e3   :  { %1362 = vrot.lane.b32.xlu1 %v1359_v39, %s1836_s5 }
0x15e4   :  { %v600_v19 = vpop.permute.xlu0 %599 }
0x15e5   :  { %v598_v20 = vpop.permute.xlu1 %597  ;;  %605 = vst.msk [vmem:[#allocation9 + $0x8] sm:$0x4] %vm603_vm7, %v600_v19 }
0x15e6   :  { %604 = vst.msk [vmem:[#allocation9] sm:$0x4] %vm603_vm7, %v598_v20 }
0x15e8   :  { %v749_v47 = vpop.permute.xlu0 %748 }
0x15e9   :  { %v747_v48 = vpop.permute.xlu1 %746  ;;  %754 = vst.msk [vmem:[#allocation9 + $0x8] sm:$0x8] %vm752_vm8, %v749_v47 }
0x15ea   :  { %753 = vst.msk [vmem:[#allocation9] sm:$0x8] %vm752_vm8, %v747_v48 }
0x15ec   :  { %v898_v49 = vpop.permute.xlu0 %897 }
0x15ed   :  { %v896_v50 = vpop.permute.xlu1 %895  ;;  %903 = vst.msk [vmem:[#allocation9 + $0x8] sm:$0x10] %vm901_vm9, %v898_v49 }
0x15ee   :  { %902 = vst.msk [vmem:[#allocation9] sm:$0x10] %vm901_vm9, %v896_v50 }
0x15f0   :  { %v1047_v51 = vpop.permute.xlu0 %1046 }
0x15f1   :  { %v1045_v52 = vpop.permute.xlu1 %1044  ;;  %1052 = vst.msk [vmem:[#allocation9 + $0x8] sm:$0x20] %vm1050_vm10, %v1047_v51 }
0x15f2   :  { %1051 = vst.msk [vmem:[#allocation9] sm:$0x20] %vm1050_vm10, %v1045_v52 }
0x15f4   :  { %v1196_v1 = vpop.permute.xlu0 %1195 }
0x15f5   :  { %v1194_v0 = vpop.permute.xlu1 %1193  ;;  %1201 = vst.msk [vmem:[#allocation9 + $0x8] sm:$0x40] %vm1199_vm11, %v1196_v1 }
0x15f6   :  { %1200 = vst.msk [vmem:[#allocation9] sm:$0x40] %vm1199_vm11, %v1194_v0 }
0x164d   :  { %v1343_v8 = vpop.permute.xlu1 %1342 }
0x164e   :  { %1349 = vst.msk [vmem:[#allocation9] sm:$0x80] %vm1348_vm12, %v1343_v8  ;;  %1355 = vst.msk [vmem:[#allocation2 - $0x7] sm:$0x80] %vm1348_vm12, %v1343_v8  ;;  %v1345_v14 = vpop.permute.xlu0 %1344 }
0x164f   :  { %1368 = vst.msk [vmem:[%s2191_s7 - $0x7] sm:$0x80] %vm1348_vm12, %v1343_v8  ;;  %1350 = vst.msk [vmem:[#allocation9 + $0x8] sm:$0x80] %vm1348_vm12, %v1345_v14 }
0x1650   :  { %1810 = shalt.err (!%p1807_p6)
}
0x1651   :  { %s1811_s25 = scalar_lea.hbm %s2190_s6, 256 }
0x1652   :  { %p1812_p7 = scmp.ne.s32.totalorder %s2190_s6, %s1811_s25  ;;  %p1815_p8 = scmp.lt.u32.totalorder %s1811_s25, %s2190_s6 }
0x1654   :  { %p1817_p9 = pnand %p1815_p8, %p1812_p7 }
0x1656   :  { %1820 = shalt.err (!%p1817_p9)
}
0x1657   :  { %1383 = dma.vmem_to_hbm [thread:$0]  %s1378_s19, 256, %s2190_s6, [#allocation6], %s1828_s15, %s1828_s15, %s1829_s16   ;;  %v1353_v57 = vpop.permute.xlu1 %1352  ;;  %v1361_v58 = vpop.permute.xlu0 %1360 }
0x1658   :  { %1356 = vst.msk [vmem:[#allocation2 + $0x1] sm:$0x1] %vm307_vm5, %v1353_v57  ;;  %1369 = vst.msk [vmem:[%s2191_s7 + $0x1] sm:$0x1] %vm307_vm5, %v1353_v57 }
0x1659   :  { %1366 = vst.msk [vmem:[#allocation3 - $0x7] sm:$0x80] %vm1348_vm12, %v1361_v58  ;;  %1370 = vst.msk [vmem:[%s2192_s8 - $0x7] sm:$0x80] %vm1348_vm12, %v1361_v58 }
0x165b   :  { %v1363_v59 = vpop.permute.xlu1 %1362 }
0x165c   :  { %1367 = vst.msk [vmem:[#allocation3 + $0x1] sm:$0x1] %vm307_vm5, %v1363_v59  ;;  %1371 = vst.msk [vmem:[%s2192_s8 + $0x1] sm:$0x1] %vm307_vm5, %v1363_v59 }
0x165d   :  { %1825 = dma.done.wait [#allocation6], 256  }
0x165e   :  { %1826 = vsyncadd [#allocation6], 4294967040 }
0x165f   :  { %1395 = vsyncpa [#allocation5], 1 }
0x1660   :  { %1396 = vsyncpa [#allocation8], 1 }
0x1661   :  { %1397 = vsyncpa [#allocation6], 1 }

</bundles_post_ra>
